<compile_context>
chip_gen: v7x
topology: tpu7x:2x2x1
jax: 0.10.0
libtpu: 0.0.40
codegen_flags: <defaults>
</compile_context>

<pallas_src>
import functools

import jax
import jax.numpy as jnp
from jax.experimental import pallas as pl
from jax.experimental.pallas import tpu as pltpu

# ----------------------------- config (small shapes) -----------------------------
B = 2                 # batch
IMG = 16              # image H = W
C_IN = 3              # image channels
PATCH = 8             # patch size -> 2x2 = 4 tokens
N_TOK = (IMG // PATCH) ** 2
PATCH_DIM = PATCH * PATCH * C_IN          # 192
D = 64                # feature_dim
HEADS = 4
HEAD_DIM = D // HEADS                     # 16
FF = 128              # ff_dim
NUM_LEVELS = 4        # abstraction levels (1 transformer block per level)
INITIAL_SIZE = 4      # decoder initial spatial size
DEC_CH = [32, 16, 3]  # decoder channels (last = RGB)
Z_DIM = DEC_CH[0] * INITIAL_SIZE * INITIAL_SIZE   # 512 (lane-dense output of fused kernel)


# ----------------------------- fused pipeline kernel -----------------------------
def _fused_pipeline_kernel(
    patches_ref, pw_ref, pb_ref, pos_ref,
    ln1g_ref, ln1b_ref, wqkv_ref, bqkv_ref, wo_ref, bo_ref,
    ln2g_ref, ln2b_ref, w1_ref, b1_ref, w2_ref, b2_ref,
    wproj_ref, bproj_ref,
    z_ref,
    x_sc, attn_sc, qkv_sc,
):
    """grid = (B, NUM_LEVELS); one batch element per outer step, one level per inner step.

    x_sc ([N_TOK, D]) carries the token activations across the level axis in VMEM.
    """
    lv = pl.program_id(1)

    # ---- level 0: patch embedding + positional embedding (per batch element) ----
    @pl.when(lv == 0)
    def _embed():
        tok = jnp.dot(patches_ref[0], pw_ref[...],
                      preferred_element_type=jnp.float32) + pb_ref[...]
        x_sc[...] = tok + pos_ref[...]

    def _ln(x, g, b):
        mu = jnp.mean(x, axis=-1, keepdims=True)
        var = jnp.mean((x - mu) ** 2, axis=-1, keepdims=True)
        return (x - mu) * jax.lax.rsqrt(var + 1e-5) * g + b

    x = x_sc[...]                                                  # [N_TOK, D]

    # ---- attention sub-block (pre-LN, fused QKV, scale folded into Wq at init) ----
    h = _ln(x, ln1g_ref[0], ln1b_ref[0])
    qkv_sc[...] = jnp.dot(h, wqkv_ref[0],
                          preferred_element_type=jnp.float32) + bqkv_ref[0]   # [N_TOK, 3D]
    for hd in range(HEADS):                                        # static unroll, HEADS=4
        c0 = hd * HEAD_DIM
        q = qkv_sc[:, c0:c0 + HEAD_DIM]                            # [N_TOK, HEAD_DIM]
        k = qkv_sc[:, D + c0:D + c0 + HEAD_DIM]
        v = qkv_sc[:, 2 * D + c0:2 * D + c0 + HEAD_DIM]
        s = jnp.dot(q, k.T, preferred_element_type=jnp.float32)    # [N_TOK, N_TOK]
        s = s - jnp.max(s, axis=-1, keepdims=True)
        p = jnp.exp(s)
        p = p * pl.reciprocal(jnp.sum(p, axis=-1, keepdims=True), approx=True)
        attn_sc[:, c0:c0 + HEAD_DIM] = jnp.dot(p, v, preferred_element_type=jnp.float32)
    o = jnp.dot(attn_sc[...], wo_ref[0], preferred_element_type=jnp.float32) + bo_ref[0]
    x = x + o                                                      # residual (in VMEM)

    # ---- FFN sub-block (pre-LN) ----
    h2 = _ln(x, ln2g_ref[0], ln2b_ref[0])
    f = jnp.dot(h2, w1_ref[0], preferred_element_type=jnp.float32) + b1_ref[0]
    # TODO(synk): PyTorch nn.GELU default is exact erf GELU; tanh-approx kept for safe Mosaic lowering.
    f = jax.nn.gelu(f, approximate=True)
    f = jnp.dot(f, w2_ref[0], preferred_element_type=jnp.float32) + b2_ref[0]
    x = x + f                                                      # residual (in VMEM)
    x_sc[...] = x

    # ---- final level: mean-pool + decoder input projection (lane-dense 512-wide output) ----
    @pl.when(lv == pl.num_programs(1) - 1)
    def _project():
        pooled = jnp.mean(x, axis=0, keepdims=True)                # [1, D]
        z_ref[0] = (jnp.dot(pooled, wproj_ref[...], preferred_element_type=jnp.float32)
                    + bproj_ref[...])


def fused_encoder_transformer_project(params, patches):
    """patches: [B, N_TOK, PATCH_DIM] -> z: [B, 1, Z_DIM] (decoder latent of last level)."""
    bsz = patches.shape[0]
    lp = params["levels_stacked"]

    def lvl_spec(r, c):
        return pl.BlockSpec((1, r, c), lambda b, lv: (lv, 0, 0))

    def const2d(r, c):
        return pl.BlockSpec((r, c), lambda b, lv: (0, 0))

    return pl.pallas_call(
        _fused_pipeline_kernel,
        out_shape=jax.ShapeDtypeStruct((bsz, 1, Z_DIM), jnp.float32),
        grid=(bsz, NUM_LEVELS),
        in_specs=[
            pl.BlockSpec((1, N_TOK, PATCH_DIM), lambda b, lv: (b, 0, 0)),   # patches
            const2d(PATCH_DIM, D),                                          # patch_w
            const2d(1, D),                                                  # patch_b
            const2d(N_TOK, D),                                              # pos_emb
            lvl_spec(1, D), lvl_spec(1, D),                                 # ln1 g/b
            lvl_spec(D, 3 * D), lvl_spec(1, 3 * D),                         # wqkv / bqkv
            lvl_spec(D, D), lvl_spec(1, D),                                 # wo / bo
            lvl_spec(1, D), lvl_spec(1, D),                                 # ln2 g/b
            lvl_spec(D, FF), lvl_spec(1, FF),                               # w1 / b1
            lvl_spec(FF, D), lvl_spec(1, D),                                # w2 / b2
            const2d(D, Z_DIM),                                              # w_proj
            const2d(1, Z_DIM),                                              # b_proj
        ],
        out_specs=pl.BlockSpec((1, 1, Z_DIM), lambda b, lv: (b, 0, 0)),
        scratch_shapes=[
            pltpu.VMEM((N_TOK, D), jnp.float32),        # x_sc (resident activations)
            pltpu.VMEM((N_TOK, D), jnp.float32),        # attn_sc (head outputs)
            pltpu.VMEM((N_TOK, 3 * D), jnp.float32),    # qkv_sc
        ],
        compiler_params=pltpu.CompilerParams(
            dimension_semantics=("parallel", "arbitrary")),
    )(patches, params["patch_w"], params["patch_b"], params["pos_emb"],
      lp["ln1_g"], lp["ln1_b"], lp["wqkv"], lp["bqkv"], lp["wo"], lp["bo"],
      lp["ln2_g"], lp["ln2_b"], lp["w1"], lp["b1"], lp["w2"], lp["b2"],
      params["dec"]["w_proj"], params["dec"]["b_proj"])


# ----------------------------- fused matmul kernel (decoder convs) -----------------------------
def _mm_kernel(act, x_ref, w_ref, b_ref, o_ref):
    y = jnp.dot(x_ref[...], w_ref[...], preferred_element_type=jnp.float32) + b_ref[...]
    if act == "relu":
        y = jnp.maximum(y, 0.0)
    elif act == "tanh":
        y = jnp.tanh(y)
    o_ref[...] = y.astype(o_ref.dtype)


def pallas_linear(x, w, b, act="none", row_blocks=1):
    """x: [M, K], w: [K, N], b: [1, N] -> [M, N]; rows split into `row_blocks` parallel blocks."""
    M, K = x.shape
    N = w.shape[1]
    bm = M // row_blocks
    return pl.pallas_call(
        functools.partial(_mm_kernel, act),
        out_shape=jax.ShapeDtypeStruct((M, N), jnp.float32),
        grid=(row_blocks,),
        in_specs=[
            pl.BlockSpec((bm, K), lambda i: (i, 0)),
            pl.BlockSpec((K, N), lambda i: (0, 0)),
            pl.BlockSpec((1, N), lambda i: (0, 0)),
        ],
        out_specs=pl.BlockSpec((bm, N), lambda i: (i, 0)),
        compiler_params=pltpu.CompilerParams(dimension_semantics=("parallel",)),
    )(x, w, b)


# ----------------------------- JAX layout glue (pure data movement) -----------------------------
def im2col_3x3(x):
    """x: [B, H, W, C] NHWC, 'same' padding -> [B*H*W, 9*C]."""
    b, h, w, c = x.shape
    xp = jnp.pad(x, ((0, 0), (1, 1), (1, 1), (0, 0)))
    cols = []
    for dy in range(3):
        for dx in range(3):
            cols.append(xp[:, dy:dy + h, dx:dx + w, :])
    return jnp.concatenate(cols, axis=-1).reshape(b * h * w, 9 * c)


def conv3x3(x, w, bias, act, row_blocks=1):
    """x: [B, H, W, Cin] NHWC; w: [9*Cin, Cout]; bias: [1, Cout]."""
    b, h, wd, _ = x.shape
    cols = im2col_3x3(x)
    y = pallas_linear(cols, w, bias, act=act, row_blocks=row_blocks)
    return y.reshape(b, h, wd, w.shape[1])


def upsample2x(x):
    """Nearest-neighbour x2 upsample, NHWC."""
    x = jnp.repeat(x, 2, axis=1)
    return jnp.repeat(x, 2, axis=2)


# ----------------------------- forward -----------------------------
def abstraction_pipeline_forward(params, image):
    """forward(image): encode -> all abstraction levels -> decode last level (default return)."""
    b = image.shape[0]
    x = jnp.transpose(image, (0, 2, 3, 1))                            # NCHW -> NHWC
    g = IMG // PATCH
    patches = (x.reshape(b, g, PATCH, g, PATCH, C_IN)
                .transpose(0, 1, 3, 2, 4, 5)
                .reshape(b, N_TOK, PATCH_DIM))

    # Single fused kernel: patch embed + 4 transformer levels + pool + decoder projection.
    # Only the final level is decoded (matches reference forward() default `decoded[-1]`).
    z = fused_encoder_transformer_project(params, patches)            # [B, 1, Z_DIM]
    x = z.reshape(b, INITIAL_SIZE, INITIAL_SIZE, DEC_CH[0])           # [B, 4, 4, 32] NHWC
    x = upsample2x(x)                                                 # [B, 8, 8, 32]
    x = conv3x3(x, params["dec"]["w_c1"], params["dec"]["b_c1"], act="relu", row_blocks=2)
    x = upsample2x(x)                                                 # [B, 16, 16, 16]
    x = conv3x3(x, params["dec"]["w_c2"], params["dec"]["b_c2"], act="tanh", row_blocks=2)
    return jnp.transpose(x, (0, 3, 1, 2))                             # NCHW [B, 3, 16, 16]


# ----------------------------- deterministic param init -----------------------------
def _w(key, shape, scale=0.02):
    return (scale * jax.random.normal(key, shape)).astype(jnp.float32)


def init_params(key):
    keys = iter(jax.random.split(key, 64))
    attn_scale = 1.0 / (HEAD_DIM ** 0.5)   # folded into Wq / bq at init (saves a VPU mul per call)

    params = {
        "patch_w": _w(next(keys), (PATCH_DIM, D)),
        "patch_b": jnp.zeros((1, D), jnp.float32),
        "pos_emb": _w(next(keys), (N_TOK, D)),
    }

    acc = {k: [] for k in ("ln1_g", "ln1_b", "wqkv", "bqkv", "wo", "bo",
                           "ln2_g", "ln2_b", "w1", "b1", "w2", "b2")}
    for _ in range(NUM_LEVELS):
        wq = _w(next(keys), (D, D)); wk = _w(next(keys), (D, D)); wv = _w(next(keys), (D, D))
        bq = jnp.zeros((1, D), jnp.float32)
        bk = jnp.zeros((1, D), jnp.float32)
        bv = jnp.zeros((1, D), jnp.float32)
        acc["wqkv"].append(jnp.concatenate([wq * attn_scale, wk, wv], axis=1))   # [D, 3D]
        acc["bqkv"].append(jnp.concatenate([bq * attn_scale, bk, bv], axis=1))   # [1, 3D]
        acc["wo"].append(_w(next(keys), (D, D)))
        acc["bo"].append(jnp.zeros((1, D), jnp.float32))
        acc["ln1_g"].append(jnp.ones((1, D), jnp.float32))
        acc["ln1_b"].append(jnp.zeros((1, D), jnp.float32))
        acc["ln2_g"].append(jnp.ones((1, D), jnp.float32))
        acc["ln2_b"].append(jnp.zeros((1, D), jnp.float32))
        acc["w1"].append(_w(next(keys), (D, FF)))
        acc["b1"].append(jnp.zeros((1, FF), jnp.float32))
        acc["w2"].append(_w(next(keys), (FF, D)))
        acc["b2"].append(jnp.zeros((1, D), jnp.float32))

    params["levels_stacked"] = {k: jnp.stack(v, axis=0).astype(jnp.float32)
                                for k, v in acc.items()}
    params["dec"] = {
        "w_proj": _w(next(keys), (D, Z_DIM)),
        "b_proj": jnp.zeros((1, Z_DIM), jnp.float32),
        "w_c1": _w(next(keys), (9 * DEC_CH[0], DEC_CH[1])),
        "b_c1": jnp.zeros((1, DEC_CH[1]), jnp.float32),
        "w_c2": _w(next(keys), (9 * DEC_CH[1], DEC_CH[2])),
        "b_c2": jnp.zeros((1, DEC_CH[2]), jnp.float32),
    }
    return params


# ----------------------------- main -----------------------------
if __name__ == "__main__":
    root = jax.random.PRNGKey(0)
    k_params, k_img = jax.random.split(root)
    params = init_params(k_params)
    image = jax.random.normal(k_img, (B, C_IN, IMG, IMG), dtype=jnp.float32)  # NCHW input

    fwd = jax.jit(abstraction_pipeline_forward)
    out = jax.block_until_ready(fwd(params, image))

    assert out.shape == (B, C_IN, IMG, IMG), out.shape
    assert bool(jnp.all(jnp.isfinite(out)))
    print("KERNEL_OK")
</pallas_src>

<mosaic_0001>
module attributes {stable_mosaic.version = 11 : i64} {
  func.func @_fused_pipeline_kernel(%arg0: i32, %arg1: i32, %arg2: memref<1x4x192xf32, #tpu.memory_space<vmem>>, %arg3: memref<192x64xf32, #tpu.memory_space<vmem>>, %arg4: memref<1x64xf32, #tpu.memory_space<vmem>>, %arg5: memref<4x64xf32, #tpu.memory_space<vmem>>, %arg6: memref<1x1x64xf32, #tpu.memory_space<vmem>>, %arg7: memref<1x1x64xf32, #tpu.memory_space<vmem>>, %arg8: memref<1x64x192xf32, #tpu.memory_space<vmem>>, %arg9: memref<1x1x192xf32, #tpu.memory_space<vmem>>, %arg10: memref<1x64x64xf32, #tpu.memory_space<vmem>>, %arg11: memref<1x1x64xf32, #tpu.memory_space<vmem>>, %arg12: memref<1x1x64xf32, #tpu.memory_space<vmem>>, %arg13: memref<1x1x64xf32, #tpu.memory_space<vmem>>, %arg14: memref<1x64x128xf32, #tpu.memory_space<vmem>>, %arg15: memref<1x1x128xf32, #tpu.memory_space<vmem>>, %arg16: memref<1x128x64xf32, #tpu.memory_space<vmem>>, %arg17: memref<1x1x64xf32, #tpu.memory_space<vmem>>, %arg18: memref<64x512xf32, #tpu.memory_space<vmem>>, %arg19: memref<1x512xf32, #tpu.memory_space<vmem>>, %arg20: memref<1x1x512xf32, #tpu.memory_space<vmem>>, %arg21: memref<4x64xf32, #tpu.memory_space<vmem>>, %arg22: memref<4x64xf32, #tpu.memory_space<vmem>>, %arg23: memref<4x192xf32, #tpu.memory_space<vmem>>) attributes {dimension_semantics = [#tpu.dimension_semantics<parallel>, #tpu.dimension_semantics<arbitrary>], iteration_bounds = array<i64: 2, 4>, scalar_prefetch = 0 : i64, scratch_operands = 3 : i64, tpu.core_type = #tpu.core_type<tc>, window_params = [{transform_indices = @transform_0, window_bounds = array<i64: 1, 4, 192>}, {pipeline_mode = #tpu.pipeline_mode<synchronous>, transform_indices = @transform_1, window_bounds = array<i64: 192, 64>}, {pipeline_mode = #tpu.pipeline_mode<synchronous>, transform_indices = @transform_2, window_bounds = array<i64: 1, 64>}, {pipeline_mode = #tpu.pipeline_mode<synchronous>, transform_indices = @transform_3, window_bounds = array<i64: 4, 64>}, {transform_indices = @transform_4, window_bounds = array<i64: 1, 1, 64>}, {transform_indices = @transform_5, window_bounds = array<i64: 1, 1, 64>}, {transform_indices = @transform_6, window_bounds = array<i64: 1, 64, 192>}, {transform_indices = @transform_7, window_bounds = array<i64: 1, 1, 192>}, {transform_indices = @transform_8, window_bounds = array<i64: 1, 64, 64>}, {transform_indices = @transform_9, window_bounds = array<i64: 1, 1, 64>}, {transform_indices = @transform_10, window_bounds = array<i64: 1, 1, 64>}, {transform_indices = @transform_11, window_bounds = array<i64: 1, 1, 64>}, {transform_indices = @transform_12, window_bounds = array<i64: 1, 64, 128>}, {transform_indices = @transform_13, window_bounds = array<i64: 1, 1, 128>}, {transform_indices = @transform_14, window_bounds = array<i64: 1, 128, 64>}, {transform_indices = @transform_15, window_bounds = array<i64: 1, 1, 64>}, {pipeline_mode = #tpu.pipeline_mode<synchronous>, transform_indices = @transform_16, window_bounds = array<i64: 64, 512>}, {pipeline_mode = #tpu.pipeline_mode<synchronous>, transform_indices = @transform_17, window_bounds = array<i64: 1, 512>}, {transform_indices = @transform_18, window_bounds = array<i64: 1, 1, 512>}]} {
    %c0_i32 = arith.constant 0 : i32
    %0 = arith.cmpi eq, %arg1, %c0_i32 : i32
    %1 = arith.extui %0 : i1 to i32
    %c0_i32_0 = arith.constant 0 : i32
    %2 = arith.cmpi ne, %1, %c0_i32_0 : i32
    scf.if %2 {
      %c0_99 = arith.constant 0 : index
      %c0_100 = arith.constant 0 : index
      %c0_101 = arith.constant 0 : index
      %173 = vector.load %arg2[%c0_99, %c0_100, %c0_101] : memref<1x4x192xf32, #tpu.memory_space<vmem>>, vector<1x4x192xf32>
      %174 = vector.shape_cast %173 : vector<1x4x192xf32> to vector<4x192xf32>
      %c0_102 = arith.constant 0 : index
      %c0_103 = arith.constant 0 : index
      %175 = vector.load %arg3[%c0_102, %c0_103] : memref<192x64xf32, #tpu.memory_space<vmem>>, vector<192x64xf32>
      %cst_104 = arith.constant dense<0.000000e+00> : vector<4x64xf32>
      %176 = tpu.matmul %174, %175, %cst_104 {dimension_numbers = #tpu.dot_dimension_numbers<[1], [0], [0], [1], [0, 0, 1, 1], [], []>} : vector<4x192xf32>, vector<192x64xf32>, vector<4x64xf32> -> vector<4x64xf32>
      %c0_105 = arith.constant 0 : index
      %c0_106 = arith.constant 0 : index
      %177 = vector.load %arg4[%c0_105, %c0_106] : memref<1x64xf32, #tpu.memory_space<vmem>>, vector<1x64xf32>
      %178 = vector.broadcast %177 : vector<1x64xf32> to vector<4x64xf32>
      %179 = arith.addf %176, %178 : vector<4x64xf32>
      %c0_107 = arith.constant 0 : index
      %c0_108 = arith.constant 0 : index
      %180 = vector.load %arg5[%c0_107, %c0_108] : memref<4x64xf32, #tpu.memory_space<vmem>>, vector<4x64xf32>
      %181 = arith.addf %179, %180 : vector<4x64xf32>
      %c0_109 = arith.constant 0 : index
      %c0_110 = arith.constant 0 : index
      %182 = vector.load %arg21[%c0_109, %c0_110] : memref<4x64xf32, #tpu.memory_space<vmem>>, vector<4x64xf32>
      tpu.vector_store %arg21[%c0_109, %c0_110], %181 {strides = array<i32>} : memref<4x64xf32, #tpu.memory_space<vmem>>, vector<4x64xf32>,
    } else {
    }
    %c0 = arith.constant 0 : index
    %c0_1 = arith.constant 0 : index
    %3 = vector.load %arg21[%c0, %c0_1] : memref<4x64xf32, #tpu.memory_space<vmem>>, vector<4x64xf32>
    %c0_2 = arith.constant 0 : index
    %c0_3 = arith.constant 0 : index
    %c0_4 = arith.constant 0 : index
    %4 = vector.load %arg6[%c0_2, %c0_3, %c0_4] : memref<1x1x64xf32, #tpu.memory_space<vmem>>, vector<1x1x64xf32>
    %5 = vector.shape_cast %4 : vector<1x1x64xf32> to vector<1x64xf32>
    %c0_5 = arith.constant 0 : index
    %c0_6 = arith.constant 0 : index
    %c0_7 = arith.constant 0 : index
    %6 = vector.load %arg7[%c0_5, %c0_6, %c0_7] : memref<1x1x64xf32, #tpu.memory_space<vmem>>, vector<1x1x64xf32>
    %7 = vector.shape_cast %6 : vector<1x1x64xf32> to vector<1x64xf32>
    %cst = arith.constant dense<0.000000e+00> : vector<4xf32>
    %8 = vector.multi_reduction <add>, %3, %cst [1] : vector<4x64xf32> to vector<4xf32>
    %9 = vector.shape_cast %8 : vector<4xf32> to vector<4x1xf32>
    %cst_8 = arith.constant 6.400000e+01 : f32
    %10 = vector.broadcast %cst_8 : f32 to vector<4x1xf32>
    %11 = arith.divf %9, %10 : vector<4x1xf32>
    %12 = vector.broadcast %11 : vector<4x1xf32> to vector<4x64xf32>
    %13 = arith.subf %3, %12 : vector<4x64xf32>
    %14 = arith.mulf %13, %13 : vector<4x64xf32>
    %cst_9 = arith.constant dense<0.000000e+00> : vector<4xf32>
    %15 = vector.multi_reduction <add>, %14, %cst_9 [1] : vector<4x64xf32> to vector<4xf32>
    %16 = vector.shape_cast %15 : vector<4xf32> to vector<4x1xf32>
    %cst_10 = arith.constant 6.400000e+01 : f32
    %17 = vector.broadcast %cst_10 : f32 to vector<4x1xf32>
    %18 = arith.divf %16, %17 : vector<4x1xf32>
    %19 = vector.broadcast %11 : vector<4x1xf32> to vector<4x64xf32>
    %20 = arith.subf %3, %19 : vector<4x64xf32>
    %cst_11 = arith.constant 9.99999974E-6 : f32
    %21 = vector.broadcast %cst_11 : f32 to vector<4x1xf32>
    %22 = arith.addf %18, %21 : vector<4x1xf32>
    %23 = math.rsqrt %22 : vector<4x1xf32>
    %24 = vector.broadcast %23 : vector<4x1xf32> to vector<4x64xf32>
    %25 = arith.mulf %20, %24 : vector<4x64xf32>
    %26 = vector.broadcast %5 : vector<1x64xf32> to vector<4x64xf32>
    %27 = arith.mulf %25, %26 : vector<4x64xf32>
    %28 = vector.broadcast %7 : vector<1x64xf32> to vector<4x64xf32>
    %29 = arith.addf %27, %28 : vector<4x64xf32>
    %c0_12 = arith.constant 0 : index
    %c0_13 = arith.constant 0 : index
    %c0_14 = arith.constant 0 : index
    %30 = vector.load %arg8[%c0_12, %c0_13, %c0_14] : memref<1x64x192xf32, #tpu.memory_space<vmem>>, vector<1x64x192xf32>
    %31 = vector.shape_cast %30 : vector<1x64x192xf32> to vector<64x192xf32>
    %cst_15 = arith.constant dense<0.000000e+00> : vector<4x192xf32>
    %32 = tpu.matmul %29, %31, %cst_15 {dimension_numbers = #tpu.dot_dimension_numbers<[1], [0], [0], [1], [0, 0, 1, 1], [], []>} : vector<4x64xf32>, vector<64x192xf32>, vector<4x192xf32> -> vector<4x192xf32>
    %c0_16 = arith.constant 0 : index
    %c0_17 = arith.constant 0 : index
    %c0_18 = arith.constant 0 : index
    %33 = vector.load %arg9[%c0_16, %c0_17, %c0_18] : memref<1x1x192xf32, #tpu.memory_space<vmem>>, vector<1x1x192xf32>
    %34 = vector.shape_cast %33 : vector<1x1x192xf32> to vector<1x192xf32>
    %35 = vector.broadcast %34 : vector<1x192xf32> to vector<4x192xf32>
    %36 = arith.addf %32, %35 : vector<4x192xf32>
    %c0_19 = arith.constant 0 : index
    %c0_20 = arith.constant 0 : index
    %37 = vector.load %arg23[%c0_19, %c0_20] : memref<4x192xf32, #tpu.memory_space<vmem>>, vector<4x192xf32>
    tpu.vector_store %arg23[%c0_19, %c0_20], %36 {strides = array<i32>} : memref<4x192xf32, #tpu.memory_space<vmem>>, vector<4x192xf32>,
    %c0_21 = arith.constant 0 : index
    %c0_22 = arith.constant 0 : index
    %38 = vector.load %arg23[%c0_21, %c0_22] : memref<4x192xf32, #tpu.memory_space<vmem>>, vector<4x16xf32>
    %c0_23 = arith.constant 0 : index
    %c64 = arith.constant 64 : index
    %39 = vector.load %arg23[%c0_23, %c64] : memref<4x192xf32, #tpu.memory_space<vmem>>, vector<4x16xf32>
    %c0_24 = arith.constant 0 : index
    %c128 = arith.constant 128 : index
    %40 = vector.load %arg23[%c0_24, %c128] : memref<4x192xf32, #tpu.memory_space<vmem>>, vector<4x16xf32>
    %41 = tpu.transpose %39, [1, 0] : vector<4x16xf32> -> vector<16x4xf32>
    %cst_25 = arith.constant dense<0.000000e+00> : vector<4x4xf32>
    %42 = tpu.matmul %38, %41, %cst_25 {dimension_numbers = #tpu.dot_dimension_numbers<[1], [0], [0], [1], [0, 0, 1, 1], [], []>} : vector<4x16xf32>, vector<16x4xf32>, vector<4x4xf32> -> vector<4x4xf32>
    %cst_26 = arith.constant dense<0xFF800000> : vector<4xf32>
    %43 = vector.multi_reduction <maximumf>, %42, %cst_26 [1] : vector<4x4xf32> to vector<4xf32>
    %44 = vector.shape_cast %43 : vector<4xf32> to vector<4x1xf32>
    %45 = vector.broadcast %44 : vector<4x1xf32> to vector<4x4xf32>
    %46 = arith.subf %42, %45 : vector<4x4xf32>
    %47 = math.exp %46 : vector<4x4xf32>
    %cst_27 = arith.constant dense<0.000000e+00> : vector<4xf32>
    %48 = vector.multi_reduction <add>, %47, %cst_27 [1] : vector<4x4xf32> to vector<4xf32>
    %49 = vector.shape_cast %48 : vector<4xf32> to vector<4x1xf32>
    %50 = tpu.reciprocal %49 {approx = true} : vector<4x1xf32> -> vector<4x1xf32>
    %51 = vector.broadcast %50 : vector<4x1xf32> to vector<4x4xf32>
    %52 = arith.mulf %47, %51 : vector<4x4xf32>
    %cst_28 = arith.constant dense<0.000000e+00> : vector<4x16xf32>
    %53 = tpu.matmul %52, %40, %cst_28 {dimension_numbers = #tpu.dot_dimension_numbers<[1], [0], [0], [1], [0, 0, 1, 1], [], []>} : vector<4x4xf32>, vector<4x16xf32>, vector<4x16xf32> -> vector<4x16xf32>
    %c0_29 = arith.constant 0 : index
    %c0_30 = arith.constant 0 : index
    %54 = vector.load %arg22[%c0_29, %c0_30] : memref<4x64xf32, #tpu.memory_space<vmem>>, vector<4x16xf32>
    tpu.vector_store %arg22[%c0_29, %c0_30], %53 {strides = array<i32>} : memref<4x64xf32, #tpu.memory_space<vmem>>, vector<4x16xf32>,
    %c0_31 = arith.constant 0 : index
    %c16 = arith.constant 16 : index
    %55 = vector.load %arg23[%c0_31, %c16] : memref<4x192xf32, #tpu.memory_space<vmem>>, vector<4x16xf32>
    %c0_32 = arith.constant 0 : index
    %c80 = arith.constant 80 : index
    %56 = vector.load %arg23[%c0_32, %c80] : memref<4x192xf32, #tpu.memory_space<vmem>>, vector<4x16xf32>
    %c0_33 = arith.constant 0 : index
    %c144 = arith.constant 144 : index
    %57 = vector.load %arg23[%c0_33, %c144] : memref<4x192xf32, #tpu.memory_space<vmem>>, vector<4x16xf32>
    %58 = tpu.transpose %56, [1, 0] : vector<4x16xf32> -> vector<16x4xf32>
    %cst_34 = arith.constant dense<0.000000e+00> : vector<4x4xf32>
    %59 = tpu.matmul %55, %58, %cst_34 {dimension_numbers = #tpu.dot_dimension_numbers<[1], [0], [0], [1], [0, 0, 1, 1], [], []>} : vector<4x16xf32>, vector<16x4xf32>, vector<4x4xf32> -> vector<4x4xf32>
    %cst_35 = arith.constant dense<0xFF800000> : vector<4xf32>
    %60 = vector.multi_reduction <maximumf>, %59, %cst_35 [1] : vector<4x4xf32> to vector<4xf32>
    %61 = vector.shape_cast %60 : vector<4xf32> to vector<4x1xf32>
    %62 = vector.broadcast %61 : vector<4x1xf32> to vector<4x4xf32>
    %63 = arith.subf %59, %62 : vector<4x4xf32>
    %64 = math.exp %63 : vector<4x4xf32>
    %cst_36 = arith.constant dense<0.000000e+00> : vector<4xf32>
    %65 = vector.multi_reduction <add>, %64, %cst_36 [1] : vector<4x4xf32> to vector<4xf32>
    %66 = vector.shape_cast %65 : vector<4xf32> to vector<4x1xf32>
    %67 = tpu.reciprocal %66 {approx = true} : vector<4x1xf32> -> vector<4x1xf32>
    %68 = vector.broadcast %67 : vector<4x1xf32> to vector<4x4xf32>
    %69 = arith.mulf %64, %68 : vector<4x4xf32>
    %cst_37 = arith.constant dense<0.000000e+00> : vector<4x16xf32>
    %70 = tpu.matmul %69, %57, %cst_37 {dimension_numbers = #tpu.dot_dimension_numbers<[1], [0], [0], [1], [0, 0, 1, 1], [], []>} : vector<4x4xf32>, vector<4x16xf32>, vector<4x16xf32> -> vector<4x16xf32>
    %c0_38 = arith.constant 0 : index
    %c16_39 = arith.constant 16 : index
    %71 = vector.load %arg22[%c0_38, %c16_39] : memref<4x64xf32, #tpu.memory_space<vmem>>, vector<4x16xf32>
    tpu.vector_store %arg22[%c0_38, %c16_39], %70 {strides = array<i32>} : memref<4x64xf32, #tpu.memory_space<vmem>>, vector<4x16xf32>,
    %c0_40 = arith.constant 0 : index
    %c32 = arith.constant 32 : index
    %72 = vector.load %arg23[%c0_40, %c32] : memref<4x192xf32, #tpu.memory_space<vmem>>, vector<4x16xf32>
    %c0_41 = arith.constant 0 : index
    %c96 = arith.constant 96 : index
    %73 = vector.load %arg23[%c0_41, %c96] : memref<4x192xf32, #tpu.memory_space<vmem>>, vector<4x16xf32>
    %c0_42 = arith.constant 0 : index
    %c160 = arith.constant 160 : index
    %74 = vector.load %arg23[%c0_42, %c160] : memref<4x192xf32, #tpu.memory_space<vmem>>, vector<4x16xf32>
    %75 = tpu.transpose %73, [1, 0] : vector<4x16xf32> -> vector<16x4xf32>
    %cst_43 = arith.constant dense<0.000000e+00> : vector<4x4xf32>
    %76 = tpu.matmul %72, %75, %cst_43 {dimension_numbers = #tpu.dot_dimension_numbers<[1], [0], [0], [1], [0, 0, 1, 1], [], []>} : vector<4x16xf32>, vector<16x4xf32>, vector<4x4xf32> -> vector<4x4xf32>
    %cst_44 = arith.constant dense<0xFF800000> : vector<4xf32>
    %77 = vector.multi_reduction <maximumf>, %76, %cst_44 [1] : vector<4x4xf32> to vector<4xf32>
    %78 = vector.shape_cast %77 : vector<4xf32> to vector<4x1xf32>
    %79 = vector.broadcast %78 : vector<4x1xf32> to vector<4x4xf32>
    %80 = arith.subf %76, %79 : vector<4x4xf32>
    %81 = math.exp %80 : vector<4x4xf32>
    %cst_45 = arith.constant dense<0.000000e+00> : vector<4xf32>
    %82 = vector.multi_reduction <add>, %81, %cst_45 [1] : vector<4x4xf32> to vector<4xf32>
    %83 = vector.shape_cast %82 : vector<4xf32> to vector<4x1xf32>
    %84 = tpu.reciprocal %83 {approx = true} : vector<4x1xf32> -> vector<4x1xf32>
    %85 = vector.broadcast %84 : vector<4x1xf32> to vector<4x4xf32>
    %86 = arith.mulf %81, %85 : vector<4x4xf32>
    %cst_46 = arith.constant dense<0.000000e+00> : vector<4x16xf32>
    %87 = tpu.matmul %86, %74, %cst_46 {dimension_numbers = #tpu.dot_dimension_numbers<[1], [0], [0], [1], [0, 0, 1, 1], [], []>} : vector<4x4xf32>, vector<4x16xf32>, vector<4x16xf32> -> vector<4x16xf32>
    %c0_47 = arith.constant 0 : index
    %c32_48 = arith.constant 32 : index
    %88 = vector.load %arg22[%c0_47, %c32_48] : memref<4x64xf32, #tpu.memory_space<vmem>>, vector<4x16xf32>
    tpu.vector_store %arg22[%c0_47, %c32_48], %87 {strides = array<i32>} : memref<4x64xf32, #tpu.memory_space<vmem>>, vector<4x16xf32>,
    %c0_49 = arith.constant 0 : index
    %c48 = arith.constant 48 : index
    %89 = vector.load %arg23[%c0_49, %c48] : memref<4x192xf32, #tpu.memory_space<vmem>>, vector<4x16xf32>
    %c0_50 = arith.constant 0 : index
    %c112 = arith.constant 112 : index
    %90 = vector.load %arg23[%c0_50, %c112] : memref<4x192xf32, #tpu.memory_space<vmem>>, vector<4x16xf32>
    %c0_51 = arith.constant 0 : index
    %c176 = arith.constant 176 : index
    %91 = vector.load %arg23[%c0_51, %c176] : memref<4x192xf32, #tpu.memory_space<vmem>>, vector<4x16xf32>
    %92 = tpu.transpose %90, [1, 0] : vector<4x16xf32> -> vector<16x4xf32>
    %cst_52 = arith.constant dense<0.000000e+00> : vector<4x4xf32>
    %93 = tpu.matmul %89, %92, %cst_52 {dimension_numbers = #tpu.dot_dimension_numbers<[1], [0], [0], [1], [0, 0, 1, 1], [], []>} : vector<4x16xf32>, vector<16x4xf32>, vector<4x4xf32> -> vector<4x4xf32>
    %cst_53 = arith.constant dense<0xFF800000> : vector<4xf32>
    %94 = vector.multi_reduction <maximumf>, %93, %cst_53 [1] : vector<4x4xf32> to vector<4xf32>
    %95 = vector.shape_cast %94 : vector<4xf32> to vector<4x1xf32>
    %96 = vector.broadcast %95 : vector<4x1xf32> to vector<4x4xf32>
    %97 = arith.subf %93, %96 : vector<4x4xf32>
    %98 = math.exp %97 : vector<4x4xf32>
    %cst_54 = arith.constant dense<0.000000e+00> : vector<4xf32>
    %99 = vector.multi_reduction <add>, %98, %cst_54 [1] : vector<4x4xf32> to vector<4xf32>
    %100 = vector.shape_cast %99 : vector<4xf32> to vector<4x1xf32>
    %101 = tpu.reciprocal %100 {approx = true} : vector<4x1xf32> -> vector<4x1xf32>
    %102 = vector.broadcast %101 : vector<4x1xf32> to vector<4x4xf32>
    %103 = arith.mulf %98, %102 : vector<4x4xf32>
    %cst_55 = arith.constant dense<0.000000e+00> : vector<4x16xf32>
    %104 = tpu.matmul %103, %91, %cst_55 {dimension_numbers = #tpu.dot_dimension_numbers<[1], [0], [0], [1], [0, 0, 1, 1], [], []>} : vector<4x4xf32>, vector<4x16xf32>, vector<4x16xf32> -> vector<4x16xf32>
    %c0_56 = arith.constant 0 : index
    %c48_57 = arith.constant 48 : index
    %105 = vector.load %arg22[%c0_56, %c48_57] : memref<4x64xf32, #tpu.memory_space<vmem>>, vector<4x16xf32>
    tpu.vector_store %arg22[%c0_56, %c48_57], %104 {strides = array<i32>} : memref<4x64xf32, #tpu.memory_space<vmem>>, vector<4x16xf32>,
    %c0_58 = arith.constant 0 : index
    %c0_59 = arith.constant 0 : index
    %106 = vector.load %arg22[%c0_58, %c0_59] : memref<4x64xf32, #tpu.memory_space<vmem>>, vector<4x64xf32>
    %c0_60 = arith.constant 0 : index
    %c0_61 = arith.constant 0 : index
    %c0_62 = arith.constant 0 : index
    %107 = vector.load %arg10[%c0_60, %c0_61, %c0_62] : memref<1x64x64xf32, #tpu.memory_space<vmem>>, vector<1x64x64xf32>
    %108 = vector.shape_cast %107 : vector<1x64x64xf32> to vector<64x64xf32>
    %cst_63 = arith.constant dense<0.000000e+00> : vector<4x64xf32>
    %109 = tpu.matmul %106, %108, %cst_63 {dimension_numbers = #tpu.dot_dimension_numbers<[1], [0], [0], [1], [0, 0, 1, 1], [], []>} : vector<4x64xf32>, vector<64x64xf32>, vector<4x64xf32> -> vector<4x64xf32>
    %c0_64 = arith.constant 0 : index
    %c0_65 = arith.constant 0 : index
    %c0_66 = arith.constant 0 : index
    %110 = vector.load %arg11[%c0_64, %c0_65, %c0_66] : memref<1x1x64xf32, #tpu.memory_space<vmem>>, vector<1x1x64xf32>
    %111 = vector.shape_cast %110 : vector<1x1x64xf32> to vector<1x64xf32>
    %112 = vector.broadcast %111 : vector<1x64xf32> to vector<4x64xf32>
    %113 = arith.addf %109, %112 : vector<4x64xf32>
    %114 = arith.addf %3, %113 : vector<4x64xf32>
    %c0_67 = arith.constant 0 : index
    %c0_68 = arith.constant 0 : index
    %c0_69 = arith.constant 0 : index
    %115 = vector.load %arg12[%c0_67, %c0_68, %c0_69] : memref<1x1x64xf32, #tpu.memory_space<vmem>>, vector<1x1x64xf32>
    %116 = vector.shape_cast %115 : vector<1x1x64xf32> to vector<1x64xf32>
    %c0_70 = arith.constant 0 : index
    %c0_71 = arith.constant 0 : index
    %c0_72 = arith.constant 0 : index
    %117 = vector.load %arg13[%c0_70, %c0_71, %c0_72] : memref<1x1x64xf32, #tpu.memory_space<vmem>>, vector<1x1x64xf32>
    %118 = vector.shape_cast %117 : vector<1x1x64xf32> to vector<1x64xf32>
    %cst_73 = arith.constant dense<0.000000e+00> : vector<4xf32>
    %119 = vector.multi_reduction <add>, %114, %cst_73 [1] : vector<4x64xf32> to vector<4xf32>
    %120 = vector.shape_cast %119 : vector<4xf32> to vector<4x1xf32>
    %cst_74 = arith.constant 6.400000e+01 : f32
    %121 = vector.broadcast %cst_74 : f32 to vector<4x1xf32>
    %122 = arith.divf %120, %121 : vector<4x1xf32>
    %123 = vector.broadcast %122 : vector<4x1xf32> to vector<4x64xf32>
    %124 = arith.subf %114, %123 : vector<4x64xf32>
    %125 = arith.mulf %124, %124 : vector<4x64xf32>
    %cst_75 = arith.constant dense<0.000000e+00> : vector<4xf32>
    %126 = vector.multi_reduction <add>, %125, %cst_75 [1] : vector<4x64xf32> to vector<4xf32>
    %127 = vector.shape_cast %126 : vector<4xf32> to vector<4x1xf32>
    %cst_76 = arith.constant 6.400000e+01 : f32
    %128 = vector.broadcast %cst_76 : f32 to vector<4x1xf32>
    %129 = arith.divf %127, %128 : vector<4x1xf32>
    %130 = vector.broadcast %122 : vector<4x1xf32> to vector<4x64xf32>
    %131 = arith.subf %114, %130 : vector<4x64xf32>
    %cst_77 = arith.constant 9.99999974E-6 : f32
    %132 = vector.broadcast %cst_77 : f32 to vector<4x1xf32>
    %133 = arith.addf %129, %132 : vector<4x1xf32>
    %134 = math.rsqrt %133 : vector<4x1xf32>
    %135 = vector.broadcast %134 : vector<4x1xf32> to vector<4x64xf32>
    %136 = arith.mulf %131, %135 : vector<4x64xf32>
    %137 = vector.broadcast %116 : vector<1x64xf32> to vector<4x64xf32>
    %138 = arith.mulf %136, %137 : vector<4x64xf32>
    %139 = vector.broadcast %118 : vector<1x64xf32> to vector<4x64xf32>
    %140 = arith.addf %138, %139 : vector<4x64xf32>
    %c0_78 = arith.constant 0 : index
    %c0_79 = arith.constant 0 : index
    %c0_80 = arith.constant 0 : index
    %141 = vector.load %arg14[%c0_78, %c0_79, %c0_80] : memref<1x64x128xf32, #tpu.memory_space<vmem>>, vector<1x64x128xf32>
    %142 = vector.shape_cast %141 : vector<1x64x128xf32> to vector<64x128xf32>
    %cst_81 = arith.constant dense<0.000000e+00> : vector<4x128xf32>
    %143 = tpu.matmul %140, %142, %cst_81 {dimension_numbers = #tpu.dot_dimension_numbers<[1], [0], [0], [1], [0, 0, 1, 1], [], []>} : vector<4x64xf32>, vector<64x128xf32>, vector<4x128xf32> -> vector<4x128xf32>
    %c0_82 = arith.constant 0 : index
    %c0_83 = arith.constant 0 : index
    %c0_84 = arith.constant 0 : index
    %144 = vector.load %arg15[%c0_82, %c0_83, %c0_84] : memref<1x1x128xf32, #tpu.memory_space<vmem>>, vector<1x1x128xf32>
    %145 = vector.shape_cast %144 : vector<1x1x128xf32> to vector<1x128xf32>
    %146 = vector.broadcast %145 : vector<1x128xf32> to vector<4x128xf32>
    %147 = arith.addf %143, %146 : vector<4x128xf32>
    %148 = arith.mulf %147, %147 : vector<4x128xf32>
    %149 = arith.mulf %147, %148 : vector<4x128xf32>
    %cst_85 = arith.constant 4.471500e-02 : f32
    %150 = vector.broadcast %cst_85 : f32 to vector<4x128xf32>
    %151 = arith.mulf %150, %149 : vector<4x128xf32>
    %152 = arith.addf %147, %151 : vector<4x128xf32>
    %cst_86 = arith.constant 0.797884583 : f32
    %153 = vector.broadcast %cst_86 : f32 to vector<4x128xf32>
    %154 = arith.mulf %153, %152 : vector<4x128xf32>
    %155 = math.tanh %154 : vector<4x128xf32>
    %cst_87 = arith.constant 1.000000e+00 : f32
    %156 = vector.broadcast %cst_87 : f32 to vector<4x128xf32>
    %157 = arith.addf %156, %155 : vector<4x128xf32>
    %cst_88 = arith.constant 5.000000e-01 : f32
    %158 = vector.broadcast %cst_88 : f32 to vector<4x128xf32>
    %159 = arith.mulf %158, %157 : vector<4x128xf32>
    %160 = arith.mulf %147, %159 : vector<4x128xf32>
    %c0_89 = arith.constant 0 : index
    %c0_90 = arith.constant 0 : index
    %c0_91 = arith.constant 0 : index
    %161 = vector.load %arg16[%c0_89, %c0_90, %c0_91] : memref<1x128x64xf32, #tpu.memory_space<vmem>>, vector<1x128x64xf32>
    %162 = vector.shape_cast %161 : vector<1x128x64xf32> to vector<128x64xf32>
    %cst_92 = arith.constant dense<0.000000e+00> : vector<4x64xf32>
    %163 = tpu.matmul %160, %162, %cst_92 {dimension_numbers = #tpu.dot_dimension_numbers<[1], [0], [0], [1], [0, 0, 1, 1], [], []>} : vector<4x128xf32>, vector<128x64xf32>, vector<4x64xf32> -> vector<4x64xf32>
    %c0_93 = arith.constant 0 : index
    %c0_94 = arith.constant 0 : index
    %c0_95 = arith.constant 0 : index
    %164 = vector.load %arg17[%c0_93, %c0_94, %c0_95] : memref<1x1x64xf32, #tpu.memory_space<vmem>>, vector<1x1x64xf32>
    %165 = vector.shape_cast %164 : vector<1x1x64xf32> to vector<1x64xf32>
    %166 = vector.broadcast %165 : vector<1x64xf32> to vector<4x64xf32>
    %167 = arith.addf %163, %166 : vector<4x64xf32>
    %168 = arith.addf %114, %167 : vector<4x64xf32>
    %c0_96 = arith.constant 0 : index
    %c0_97 = arith.constant 0 : index
    %169 = vector.load %arg21[%c0_96, %c0_97] : memref<4x64xf32, #tpu.memory_space<vmem>>, vector<4x64xf32>
    tpu.vector_store %arg21[%c0_96, %c0_97], %168 {strides = array<i32>} : memref<4x64xf32, #tpu.memory_space<vmem>>, vector<4x64xf32>,
    %c3_i32 = arith.constant 3 : i32
    %170 = arith.cmpi eq, %arg1, %c3_i32 : i32
    %171 = arith.extui %170 : i1 to i32
    %c0_i32_98 = arith.constant 0 : i32
    %172 = arith.cmpi ne, %171, %c0_i32_98 : i32
    scf.if %172 {
      %cst_99 = arith.constant dense<0.000000e+00> : vector<64xf32>
      %173 = vector.multi_reduction <add>, %168, %cst_99 [0] : vector<4x64xf32> to vector<64xf32>
      %174 = vector.shape_cast %173 : vector<64xf32> to vector<1x64xf32>
      %cst_100 = arith.constant 4.000000e+00 : f32
      %175 = vector.broadcast %cst_100 : f32 to vector<1x64xf32>
      %176 = arith.divf %174, %175 : vector<1x64xf32>
      %c0_101 = arith.constant 0 : index
      %c0_102 = arith.constant 0 : index
      %177 = vector.load %arg18[%c0_101, %c0_102] : memref<64x512xf32, #tpu.memory_space<vmem>>, vector<64x512xf32>
      %cst_103 = arith.constant dense<0.000000e+00> : vector<1x512xf32>
      %178 = tpu.matmul %176, %177, %cst_103 {dimension_numbers = #tpu.dot_dimension_numbers<[1], [0], [0], [1], [0, 0, 1, 1], [], []>} : vector<1x64xf32>, vector<64x512xf32>, vector<1x512xf32> -> vector<1x512xf32>
      %c0_104 = arith.constant 0 : index
      %c0_105 = arith.constant 0 : index
      %179 = vector.load %arg19[%c0_104, %c0_105] : memref<1x512xf32, #tpu.memory_space<vmem>>, vector<1x512xf32>
      %180 = arith.addf %178, %179 : vector<1x512xf32>
      %c0_106 = arith.constant 0 : index
      %c0_107 = arith.constant 0 : index
      %c0_108 = arith.constant 0 : index
      %181 = vector.load %arg20[%c0_106, %c0_107, %c0_108] : memref<1x1x512xf32, #tpu.memory_space<vmem>>, vector<1x1x512xf32>
      %182 = vector.shape_cast %181 : vector<1x1x512xf32> to vector<1x512xf32>
      %183 = vector.shape_cast %180 : vector<1x512xf32> to vector<1x1x512xf32>
      tpu.vector_store %arg20[%c0_106, %c0_107, %c0_108], %183 {strides = array<i32>} : memref<1x1x512xf32, #tpu.memory_space<vmem>>, vector<1x1x512xf32>,
    } else {
    }
    return
  }
  func.func @transform_0(%arg0: i32, %arg1: i32) -> (i32, i32, i32) {
    %c0_i32 = arith.constant 0 : i32
    %c0_i32_0 = arith.constant 0 : i32
    %c0_i32_1 = arith.constant 0 : i32
    return %arg0, %c0_i32, %c0_i32_0 : i32, i32, i32
  }
  func.func @transform_1(%arg0: i32, %arg1: i32) -> (i32, i32) {
    %c0_i32 = arith.constant 0 : i32
    %c0_i32_0 = arith.constant 0 : i32
    %c0_i32_1 = arith.constant 0 : i32
    return %c0_i32, %c0_i32_0 : i32, i32
  }
  func.func @transform_2(%arg0: i32, %arg1: i32) -> (i32, i32) {
    %c0_i32 = arith.constant 0 : i32
    %c0_i32_0 = arith.constant 0 : i32
    %c0_i32_1 = arith.constant 0 : i32
    return %c0_i32, %c0_i32_0 : i32, i32
  }
  func.func @transform_3(%arg0: i32, %arg1: i32) -> (i32, i32) {
    %c0_i32 = arith.constant 0 : i32
    %c0_i32_0 = arith.constant 0 : i32
    %c0_i32_1 = arith.constant 0 : i32
    return %c0_i32, %c0_i32_0 : i32, i32
  }
  func.func @transform_4(%arg0: i32, %arg1: i32) -> (i32, i32, i32) {
    %c0_i32 = arith.constant 0 : i32
    %c0_i32_0 = arith.constant 0 : i32
    %c0_i32_1 = arith.constant 0 : i32
    return %arg1, %c0_i32, %c0_i32_0 : i32, i32, i32
  }
  func.func @transform_5(%arg0: i32, %arg1: i32) -> (i32, i32, i32) {
    %c0_i32 = arith.constant 0 : i32
    %c0_i32_0 = arith.constant 0 : i32
    %c0_i32_1 = arith.constant 0 : i32
    return %arg1, %c0_i32, %c0_i32_0 : i32, i32, i32
  }
  func.func @transform_6(%arg0: i32, %arg1: i32) -> (i32, i32, i32) {
    %c0_i32 = arith.constant 0 : i32
    %c0_i32_0 = arith.constant 0 : i32
    %c0_i32_1 = arith.constant 0 : i32
    return %arg1, %c0_i32, %c0_i32_0 : i32, i32, i32
  }
  func.func @transform_7(%arg0: i32, %arg1: i32) -> (i32, i32, i32) {
    %c0_i32 = arith.constant 0 : i32
    %c0_i32_0 = arith.constant 0 : i32
    %c0_i32_1 = arith.constant 0 : i32
    return %arg1, %c0_i32, %c0_i32_0 : i32, i32, i32
  }
  func.func @transform_8(%arg0: i32, %arg1: i32) -> (i32, i32, i32) {
    %c0_i32 = arith.constant 0 : i32
    %c0_i32_0 = arith.constant 0 : i32
    %c0_i32_1 = arith.constant 0 : i32
    return %arg1, %c0_i32, %c0_i32_0 : i32, i32, i32
  }
  func.func @transform_9(%arg0: i32, %arg1: i32) -> (i32, i32, i32) {
    %c0_i32 = arith.constant 0 : i32
    %c0_i32_0 = arith.constant 0 : i32
    %c0_i32_1 = arith.constant 0 : i32
    return %arg1, %c0_i32, %c0_i32_0 : i32, i32, i32
  }
  func.func @transform_10(%arg0: i32, %arg1: i32) -> (i32, i32, i32) {
    %c0_i32 = arith.constant 0 : i32
    %c0_i32_0 = arith.constant 0 : i32
    %c0_i32_1 = arith.constant 0 : i32
    return %arg1, %c0_i32, %c0_i32_0 : i32, i32, i32
  }
  func.func @transform_11(%arg0: i32, %arg1: i32) -> (i32, i32, i32) {
    %c0_i32 = arith.constant 0 : i32
    %c0_i32_0 = arith.constant 0 : i32
    %c0_i32_1 = arith.constant 0 : i32
    return %arg1, %c0_i32, %c0_i32_0 : i32, i32, i32
  }
  func.func @transform_12(%arg0: i32, %arg1: i32) -> (i32, i32, i32) {
    %c0_i32 = arith.constant 0 : i32
    %c0_i32_0 = arith.constant 0 : i32
    %c0_i32_1 = arith.constant 0 : i32
    return %arg1, %c0_i32, %c0_i32_0 : i32, i32, i32
  }
  func.func @transform_13(%arg0: i32, %arg1: i32) -> (i32, i32, i32) {
    %c0_i32 = arith.constant 0 : i32
    %c0_i32_0 = arith.constant 0 : i32
    %c0_i32_1 = arith.constant 0 : i32
    return %arg1, %c0_i32, %c0_i32_0 : i32, i32, i32
  }
  func.func @transform_14(%arg0: i32, %arg1: i32) -> (i32, i32, i32) {
    %c0_i32 = arith.constant 0 : i32
    %c0_i32_0 = arith.constant 0 : i32
    %c0_i32_1 = arith.constant 0 : i32
    return %arg1, %c0_i32, %c0_i32_0 : i32, i32, i32
  }
  func.func @transform_15(%arg0: i32, %arg1: i32) -> (i32, i32, i32) {
    %c0_i32 = arith.constant 0 : i32
    %c0_i32_0 = arith.constant 0 : i32
    %c0_i32_1 = arith.constant 0 : i32
    return %arg1, %c0_i32, %c0_i32_0 : i32, i32, i32
  }
  func.func @transform_16(%arg0: i32, %arg1: i32) -> (i32, i32) {
    %c0_i32 = arith.constant 0 : i32
    %c0_i32_0 = arith.constant 0 : i32
    %c0_i32_1 = arith.constant 0 : i32
    return %c0_i32, %c0_i32_0 : i32, i32
  }
  func.func @transform_17(%arg0: i32, %arg1: i32) -> (i32, i32) {
    %c0_i32 = arith.constant 0 : i32
    %c0_i32_0 = arith.constant 0 : i32
    %c0_i32_1 = arith.constant 0 : i32
    return %c0_i32, %c0_i32_0 : i32, i32
  }
  func.func @transform_18(%arg0: i32, %arg1: i32) -> (i32, i32, i32) {
    %c0_i32 = arith.constant 0 : i32
    %c0_i32_0 = arith.constant 0 : i32
    %c0_i32_1 = arith.constant 0 : i32
    return %arg0, %c0_i32, %c0_i32_0 : i32, i32, i32
  }
}

module attributes {stable_mosaic.version = 11 : i64} {
  func.func @_mm_kernel(%arg0: i32, %arg1: memref<64x288xf32, #tpu.memory_space<vmem>>, %arg2: memref<288x16xf32, #tpu.memory_space<vmem>>, %arg3: memref<1x16xf32, #tpu.memory_space<vmem>>, %arg4: memref<64x16xf32, #tpu.memory_space<vmem>>) attributes {dimension_semantics = [#tpu.dimension_semantics<parallel>], iteration_bounds = array<i64: 2>, scalar_prefetch = 0 : i64, scratch_operands = 0 : i64, tpu.core_type = #tpu.core_type<tc>, window_params = [{transform_indices = @transform_0, window_bounds = array<i64: 64, 288>}, {pipeline_mode = #tpu.pipeline_mode<synchronous>, transform_indices = @transform_1, window_bounds = array<i64: 288, 16>}, {pipeline_mode = #tpu.pipeline_mode<synchronous>, transform_indices = @transform_2, window_bounds = array<i64: 1, 16>}, {transform_indices = @transform_3, window_bounds = array<i64: 64, 16>}]} {
    %c0 = arith.constant 0 : index
    %c0_0 = arith.constant 0 : index
    %0 = vector.load %arg1[%c0, %c0_0] : memref<64x288xf32, #tpu.memory_space<vmem>>, vector<64x288xf32>
    %c0_1 = arith.constant 0 : index
    %c0_2 = arith.constant 0 : index
    %1 = vector.load %arg2[%c0_1, %c0_2] : memref<288x16xf32, #tpu.memory_space<vmem>>, vector<288x16xf32>
    %cst = arith.constant dense<0.000000e+00> : vector<64x16xf32>
    %2 = tpu.matmul %0, %1, %cst {dimension_numbers = #tpu.dot_dimension_numbers<[1], [0], [0], [1], [0, 0, 1, 1], [], []>} : vector<64x288xf32>, vector<288x16xf32>, vector<64x16xf32> -> vector<64x16xf32>
    %c0_3 = arith.constant 0 : index
    %c0_4 = arith.constant 0 : index
    %3 = vector.load %arg3[%c0_3, %c0_4] : memref<1x16xf32, #tpu.memory_space<vmem>>, vector<1x16xf32>
    %4 = vector.broadcast %3 : vector<1x16xf32> to vector<64x16xf32>
    %5 = arith.addf %2, %4 : vector<64x16xf32>
    %cst_5 = arith.constant 0.000000e+00 : f32
    %6 = vector.broadcast %cst_5 : f32 to vector<64x16xf32>
    %7 = arith.maximumf %5, %6 : vector<64x16xf32>
    %c0_6 = arith.constant 0 : index
    %c0_7 = arith.constant 0 : index
    %8 = vector.load %arg4[%c0_6, %c0_7] : memref<64x16xf32, #tpu.memory_space<vmem>>, vector<64x16xf32>
    tpu.vector_store %arg4[%c0_6, %c0_7], %7 {strides = array<i32>} : memref<64x16xf32, #tpu.memory_space<vmem>>, vector<64x16xf32>,
    return
  }
  func.func @transform_0(%arg0: i32) -> (i32, i32) {
    %c0_i32 = arith.constant 0 : i32
    %c0_i32_0 = arith.constant 0 : i32
    return %arg0, %c0_i32 : i32, i32
  }
  func.func @transform_1(%arg0: i32) -> (i32, i32) {
    %c0_i32 = arith.constant 0 : i32
    %c0_i32_0 = arith.constant 0 : i32
    %c0_i32_1 = arith.constant 0 : i32
    return %c0_i32, %c0_i32_0 : i32, i32
  }
  func.func @transform_2(%arg0: i32) -> (i32, i32) {
    %c0_i32 = arith.constant 0 : i32
    %c0_i32_0 = arith.constant 0 : i32
    %c0_i32_1 = arith.constant 0 : i32
    return %c0_i32, %c0_i32_0 : i32, i32
  }
  func.func @transform_3(%arg0: i32) -> (i32, i32) {
    %c0_i32 = arith.constant 0 : i32
    %c0_i32_0 = arith.constant 0 : i32
    return %arg0, %c0_i32 : i32, i32
  }
}

module attributes {stable_mosaic.version = 11 : i64} {
  func.func @_mm_kernel(%arg0: i32, %arg1: memref<256x144xf32, #tpu.memory_space<vmem>>, %arg2: memref<144x3xf32, #tpu.memory_space<vmem>>, %arg3: memref<1x3xf32, #tpu.memory_space<vmem>>, %arg4: memref<256x3xf32, #tpu.memory_space<vmem>>) attributes {dimension_semantics = [#tpu.dimension_semantics<parallel>], iteration_bounds = array<i64: 2>, scalar_prefetch = 0 : i64, scratch_operands = 0 : i64, tpu.core_type = #tpu.core_type<tc>, window_params = [{transform_indices = @transform_0, window_bounds = array<i64: 256, 144>}, {pipeline_mode = #tpu.pipeline_mode<synchronous>, transform_indices = @transform_1, window_bounds = array<i64: 144, 3>}, {pipeline_mode = #tpu.pipeline_mode<synchronous>, transform_indices = @transform_2, window_bounds = array<i64: 1, 3>}, {transform_indices = @transform_3, window_bounds = array<i64: 256, 3>}]} {
    %c0 = arith.constant 0 : index
    %c0_0 = arith.constant 0 : index
    %0 = vector.load %arg1[%c0, %c0_0] : memref<256x144xf32, #tpu.memory_space<vmem>>, vector<256x144xf32>
    %c0_1 = arith.constant 0 : index
    %c0_2 = arith.constant 0 : index
    %1 = vector.load %arg2[%c0_1, %c0_2] : memref<144x3xf32, #tpu.memory_space<vmem>>, vector<144x3xf32>
    %cst = arith.constant dense<0.000000e+00> : vector<256x3xf32>
    %2 = tpu.matmul %0, %1, %cst {dimension_numbers = #tpu.dot_dimension_numbers<[1], [0], [0], [1], [0, 0, 1, 1], [], []>} : vector<256x144xf32>, vector<144x3xf32>, vector<256x3xf32> -> vector<256x3xf32>
    %c0_3 = arith.constant 0 : index
    %c0_4 = arith.constant 0 : index
    %3 = vector.load %arg3[%c0_3, %c0_4] : memref<1x3xf32, #tpu.memory_space<vmem>>, vector<1x3xf32>
    %4 = vector.broadcast %3 : vector<1x3xf32> to vector<256x3xf32>
    %5 = arith.addf %2, %4 : vector<256x3xf32>
    %6 = math.tanh %5 : vector<256x3xf32>
    %c0_5 = arith.constant 0 : index
    %c0_6 = arith.constant 0 : index
    %7 = vector.load %arg4[%c0_5, %c0_6] : memref<256x3xf32, #tpu.memory_space<vmem>>, vector<256x3xf32>
    tpu.vector_store %arg4[%c0_5, %c0_6], %6 {strides = array<i32>} : memref<256x3xf32, #tpu.memory_space<vmem>>, vector<256x3xf32>,
    return
  }
  func.func @transform_0(%arg0: i32) -> (i32, i32) {
    %c0_i32 = arith.constant 0 : i32
    %c0_i32_0 = arith.constant 0 : i32
    return %arg0, %c0_i32 : i32, i32
  }
  func.func @transform_1(%arg0: i32) -> (i32, i32) {
    %c0_i32 = arith.constant 0 : i32
    %c0_i32_0 = arith.constant 0 : i32
    %c0_i32_1 = arith.constant 0 : i32
    return %c0_i32, %c0_i32_0 : i32, i32
  }
  func.func @transform_2(%arg0: i32) -> (i32, i32) {
    %c0_i32 = arith.constant 0 : i32
    %c0_i32_0 = arith.constant 0 : i32
    %c0_i32_1 = arith.constant 0 : i32
    return %c0_i32, %c0_i32_0 : i32, i32
  }
  func.func @transform_3(%arg0: i32) -> (i32, i32) {
    %c0_i32 = arith.constant 0 : i32
    %c0_i32_0 = arith.constant 0 : i32
    return %arg0, %c0_i32 : i32, i32
  }
}

</mosaic_0001>

<bundles_post_ra>
// kernel: abstraction_pipeline_forward.4
= control target key start
LH: loop header
LB: loop body
LE: loop exit
PB: predicated region body
PF: predicated region fallthrough
CT: control target
= control target key end

     0   :  { %s753_s12 = smov 0   ;;  %s937_s0 = inlined_call_operand.vmem [shape: f32[128,288], index: 0, kind: input, shape index: {}]   ;;  %s938_s1 = inlined_call_operand.vmem [shape: f32[288,16], index: 1, kind: input, shape index: {}]   ;;  %s939_s2 = inlined_call_operand.vmem [shape: f32[1,16], index: 2, kind: input, shape index: {}]   ;;  %s940_s3 = inlined_call_operand.vmem [shape: f32[128,16], index: 3, kind: output, shape index: {}]  }
   0x1 LB: > { %s552_s13 = sadd.s32 4294967295, %s731_s12   ;;  %p556_p0 = scmp.ge.s32.totalorder %s731_s12, 1  ;;  %s731_s12 = sphi %s753_s12, %s13_s12  }
   0x2   : > { %p139_p1 = scmp.lt.s32.totalorder %s731_s12, 3 }
   0x4   : > { %p140_p2 = pnand %p556_p0, %p139_p1 }
   0x5   : > { %v217_v0 = vld [vmem:[%s938_s1 + $0x80] sm:$0xff] (!%p140_p2)  ;;  %v218_v1 = vld [vmem:[%s938_s1 + $0x88] sm:$0xff] (!%p140_p2)  ;;  %s557_s20 = sshll.u32 (!%p140_p2), %s552_s13, 3  ;;  %v219_v5 = vld [vmem:[%s938_s1 + $0x90] sm:$0xff] (!%p140_p2)  ;;  %vm244_vm0 = vcmask (!%p140_p2), 261120   ;;  %vm487_vm1 = vcmask (!%p140_p2), 130048  }
   0x6   : > { %143 = sbr.rel (%p140_p2) target bundleno = 282 (0x11a), region = 32  ;;  %v201_v2 = vld [vmem:[%s938_s1] sm:$0xff] (!%p140_p2)  ;;  %v660_v3 = vpack.c.bf16 (!%p140_p2), %v218_v1, %v217_v0  ;;  %v202_v4 = vld [vmem:[%s938_s1 + $0x8] sm:$0xff] (!%p140_p2)  ;;  %v220_v6 = vld [vmem:[%s938_s1 + $0x98] sm:$0xff] (!%p140_p2)  ;;  %p165_p3 = scmp.lt.s32.totalorder (!%p140_p2), %s557_s20, 15 }
   0x7   : > { %v662_v7 = vpack.c.bf16 (!%p140_p2), %v202_v4, %v201_v2  ;;  %v664_v8 = vpack.c.bf16 (!%p140_p2), %v220_v6, %v219_v5  ;;  %v203_v9 = vld [vmem:[%s938_s1 + $0x10] sm:$0xff] (!%p140_p2)  ;;  %v204_v10 = vld [vmem:[%s938_s1 + $0x18] sm:$0xff] (!%p140_p2)  ;;  %v221_v11 = vld [vmem:[%s938_s1 + $0xa0] sm:$0xff] (!%p140_p2) }
   0x8   : > { %661 = vmatprep.subr.bf16.mxu0 (!%p140_p2), %v660_v3  ;;  %700 = vmatprep.subr.bf16.mxu1 (!%p140_p2), %v660_v3  ;;  %v222_v12 = vld [vmem:[%s938_s1 + $0xa8] sm:$0xff] (!%p140_p2)  ;;  %v666_v13 = vpack.c.bf16 (!%p140_p2), %v204_v10, %v203_v9  ;;  %v205_v15 = vld [vmem:[%s938_s1 + $0x20] sm:$0xff] (!%p140_p2)  ;;  %v223_v17 = vld [vmem:[%s938_s1 + $0xb0] sm:$0xff] (!%p140_p2) }
   0x9   : > { %663 = vmatpush3.bf16.msra.mxu0 (!%p140_p2), %v662_v7  ;;  %708 = vmatpush3.bf16.msra.mxu1 (!%p140_p2), %v662_v7  ;;  %v668_v14 = vpack.c.bf16 (!%p140_p2), %v222_v12, %v221_v11  ;;  %v206_v16 = vld [vmem:[%s938_s1 + $0x28] sm:$0xff] (!%p140_p2)  ;;  %v224_v18 = vld [vmem:[%s938_s1 + $0xb8] sm:$0xff] (!%p140_p2)  ;;  %v207_v21 = vld [vmem:[%s938_s1 + $0x30] sm:$0xff] (!%p140_p2) }
   0xa   : > { %665 = vmatprep.subr.bf16.mxu0 (!%p140_p2), %v664_v8  ;;  %701 = vmatprep.subr.bf16.mxu1 (!%p140_p2), %v664_v8  ;;  %v670_v19 = vpack.c.bf16 (!%p140_p2), %v206_v16, %v205_v15  ;;  %v672_v20 = vpack.c.bf16 (!%p140_p2), %v224_v18, %v223_v17  ;;  %v208_v22 = vld [vmem:[%s938_s1 + $0x38] sm:$0xff] (!%p140_p2)  ;;  %v225_v23 = vld [vmem:[%s938_s1 + $0xc0] sm:$0xff] (!%p140_p2)  ;;  %v226_v24 = vld [vmem:[%s938_s1 + $0xc8] sm:$0xff] (!%p140_p2) }
   0xb   : > { %v674_v27 = vpack.c.bf16 (!%p140_p2), %v208_v22, %v207_v21  ;;  %v676_v28 = vpack.c.bf16 (!%p140_p2), %v226_v24, %v225_v23  ;;  %v209_v29 = vld [vmem:[%s938_s1 + $0x40] sm:$0xff] (!%p140_p2)  ;;  %v210_v30 = vld [vmem:[%s938_s1 + $0x48] sm:$0xff] (!%p140_p2)  ;;  %v227_v31 = vld [vmem:[%s938_s1 + $0xd0] sm:$0xff] (!%p140_p2) }
   0xc   : > { %v228_v32 = vld [vmem:[%s938_s1 + $0xd8] sm:$0xff] (!%p140_p2)  ;;  %v678_v33 = vpack.c.bf16 (!%p140_p2), %v210_v30, %v209_v29  ;;  %v211_v35 = vld [vmem:[%s938_s1 + $0x50] sm:$0xff] (!%p140_p2)  ;;  %v229_v37 = vld [vmem:[%s938_s1 + $0xe0] sm:$0xff] (!%p140_p2) }
   0xd   : > { %s942_s20 = smov (!%p165_p3, %s557_s20), 15  ;;  %667 = vmatpush3.bf16.msra.mxu0 %v666_v13  ;;  %709 = vmatpush3.bf16.msra.mxu1 %v666_v13  ;;  %v680_v34 = vpack.c.bf16 %v228_v32, %v227_v31  ;;  %v212_v36 = vld [vmem:[%s938_s1 + $0x58] sm:$0xff]  ;;  %v230_v38 = vld [vmem:[%s938_s1 + $0xe8] sm:$0xff]  ;;  %v213_v41 = vld [vmem:[%s938_s1 + $0x60] sm:$0xff] }
   0xe   : > { %s716_s13 = smul.u32 24, %s942_s20  ;;  %669 = vmatprep.subr.bf16.mxu0 %v668_v14  ;;  %702 = vmatprep.subr.bf16.mxu1 %v668_v14  ;;  %v682_v39 = vpack.c.bf16 %v212_v36, %v211_v35  ;;  %v684_v40 = vpack.c.bf16 %v230_v38, %v229_v37  ;;  %v214_v42 = vld [vmem:[%s938_s1 + $0x68] sm:$0xff]  ;;  %v231_v43 = vld [vmem:[%s938_s1 + $0xf0] sm:$0xff]  ;;  %v232_v44 = vld [vmem:[%s938_s1 + $0xf8] sm:$0xff] }
   0xf   : > { %v686_v45 = vpack.c.bf16 %v214_v42, %v213_v41  ;;  %v688_v46 = vpack.c.bf16 %v232_v44, %v231_v43  ;;  %v215_v47 = vld [vmem:[%s938_s1 + $0x70] sm:$0xff]  ;;  %v216_v48 = vld [vmem:[%s938_s1 + $0x78] sm:$0xff]  ;;  %v233_v49 = vld [vmem:[%s938_s1 + $0x100] sm:$0xff] }
  0x10   : > { %s809_s21 = scalar_lea.vmem %s937_s0, %s716_s13  ;;  %v234_v50 = vld [vmem:[%s938_s1 + $0x108] sm:$0xff]  ;;  %v690_v51 = vpack.c.bf16 %v216_v48, %v215_v47  ;;  %v235_v53 = vld [vmem:[%s938_s1 + $0x110] sm:$0xff]  ;;  %v236_v54 = vld [vmem:[%s938_s1 + $0x118] sm:$0xff] }
  0x11   : > { %v178_v25 = vld [vmem:[%s809_s21 + $0x8] sm:$0xff]  ;;  %v196_v26 = vld [vmem:[%s809_s21 + $0x98] sm:$0xff]  ;;  %671 = vmatpush3.bf16.msra.mxu0 %v670_v19  ;;  %710 = vmatpush3.bf16.msra.mxu1 %v670_v19  ;;  %v692_v52 = vpack.c.bf16 %v234_v50, %v233_v49  ;;  %v177_v55 = vld [vmem:[%s809_s21] sm:$0xff]  ;;  %v696_v58 = vpack.c.bf16 %v236_v54, %v235_v53 }
  0x12   : > { %333 = vmatprep.mubr.f32.mxu0 %v178_v25  ;;  %673 = vmatprep.subr.bf16.mxu0 %v672_v20  ;;  %v195_v56 = vld [vmem:[%s809_s21 + $0x90] sm:$0xff]  ;;  %v181_v57 = vld [vmem:[%s809_s21 + $0x20] sm:$0xff]  ;;  %v180_v60 = vld [vmem:[%s809_s21 + $0x18] sm:$0xff] }
  0x13   : > { %703 = vmatprep.subr.bf16.mxu1 %v672_v20  ;;  %363 = vmatprep.mubr.f32.mxu1 %v196_v26  ;;  %v199_v59 = vld [vmem:[%s809_s21 + $0xb0] sm:$0xff]  ;;  %v198_v61 = vld [vmem:[%s809_s21 + $0xa8] sm:$0xff]  ;;  %v184_v62 = vld [vmem:[%s809_s21 + $0x38] sm:$0xff] }
  0x14   : > { %v179_v63 = vld [vmem:[%s809_s21 + $0x10] sm:$0xff]  ;;  %v182_v1 = vld [vmem:[%s809_s21 + $0x28] sm:$0xff]  ;;  %v185_v3 = vld [vmem:[%s809_s21 + $0x40] sm:$0xff] }
  0x15   : > { %675 = vmatpush3.bf16.msra.mxu0 %v674_v27  ;;  %711 = vmatpush3.bf16.msra.mxu1 %v674_v27  ;;  %v183_v0 = vld [vmem:[%s809_s21 + $0x30] sm:$0xff]  ;;  %v186_v4 = vld [vmem:[%s809_s21 + $0x48] sm:$0xff]  ;;  %v188_v5 = vld [vmem:[%s809_s21 + $0x58] sm:$0xff] }
  0x16   : > { %677 = vmatprep.subr.bf16.mxu0 %v676_v28  ;;  %704 = vmatprep.subr.bf16.mxu1 %v676_v28  ;;  %v187_v2 = vld [vmem:[%s809_s21 + $0x50] sm:$0xff]  ;;  %v190_v6 = vld [vmem:[%s809_s21 + $0x68] sm:$0xff]  ;;  %v189_v8 = vld [vmem:[%s809_s21 + $0x60] sm:$0xff] }
  0x17   : > { %v191_v7 = vld [vmem:[%s809_s21 + $0x70] sm:$0xff]  ;;  %v194_v9 = vld [vmem:[%s809_s21 + $0x88] sm:$0xff]  ;;  %v193_v10 = vld [vmem:[%s809_s21 + $0x80] sm:$0xff] }
  0x18   : > { %v197_v11 = vld [vmem:[%s809_s21 + $0xa0] sm:$0xff]  ;;  %v192_v12 = vld [vmem:[%s809_s21 + $0x78] sm:$0xff] }
  0x19   : > { %679 = vmatpush3.bf16.msra.mxu0 %v678_v33  ;;  %712 = vmatpush3.bf16.msra.mxu1 %v678_v33  ;;  %v200_v13 = vld [vmem:[%s809_s21 + $0xb8] sm:$0xff]  ;;  %v561_v24 = vld [vmem:[%s939_s2] ss:$0 sm:$0xff]  ;;  %s560_s21 = sshll.u32 %s942_s20, 3 }
  0x1a   : > { %681 = vmatprep.subr.bf16.mxu0 %v680_v34  ;;  %705 = vmatprep.subr.bf16.mxu1 %v680_v34  ;;  %s916_s22 = scalar_lea.vmem %s940_s3, %s560_s21 }
  0x1d   : > { %683 = vmatpush3.bf16.msra.mxu0 %v682_v39  ;;  %713 = vmatpush3.bf16.msra.mxu1 %v682_v39 }
  0x1e   : > { %685 = vmatprep.subr.bf16.mxu0 %v684_v40  ;;  %706 = vmatprep.subr.bf16.mxu1 %v684_v40 }
  0x21   : > { %687 = vmatpush3.bf16.msra.mxu0 %v686_v45  ;;  %714 = vmatpush3.bf16.msra.mxu1 %v686_v45 }
  0x22   : > { %689 = vmatprep.subr.bf16.mxu0 %v688_v46  ;;  %707 = vmatprep.subr.bf16.mxu1 %v688_v46 }
  0x25   : > { %691 = vmatpush3.bf16.msra.mxu0 %v690_v51  ;;  %715 = vmatpush3.bf16.msra.mxu1 %v690_v51 }
  0x26   : > { %693 = vmatprep.subr.bf16.mxu1 %v692_v52 }
  0x28   : > { %334 = vmatmul.mubr.f32.vlgmr.msra.gmra.mrb[0].mxu0 %v177_v55  ;;  %364 = vmatmul.mubr.f32.vlgmr.msra.gmra.mrb[0].mxu1 %v195_v56 }
  0x29   : > { %695 = vmatpush3.bf16.msra.mxu1 %v692_v52  ;;  %338 = vmatprep.mubr.f32.mxu0 %v181_v57 }
  0x2a   : > { %368 = vmatprep.mubr.f32.mxu1 %v199_v59  ;;  %697 = vmatprep.subr.bf16.mxu1 %v696_v58 }
  0x2c   : > { %339 = vmatmul.mubr.f32.gmra.mrb[2].mxu0 %v180_v60  ;;  %369 = vmatmul.mubr.f32.gmra.mrb[2].mxu1 %v198_v61 }
  0x2d   : > { %699 = vmatpush3.bf16.msra.mxu1 %v696_v58  ;;  %343 = vmatprep.mubr.f32.mxu0 %v184_v62 }
  0x2e   : > { %648 = vmatprep.mubr.msk.f32.mxu1 %vm244_vm0, %v179_v63 }
  0x30   : > { %344 = vmatmul.mubr.f32.gmra.mrb[4].mxu0 %v183_v0  ;;  %649 = vmatmul.mubr.msk.f32.vlgmr.msra.gmra.mrb[4].mxu1 %vm244_vm0, %v182_v1 }
  0x31   : > { %348 = vmatprep.mubr.f32.mxu0 %v187_v2  ;;  %651 = vmatprep.mubr.msk.f32.mxu1 %vm244_vm0, %v185_v3 }
  0x34   : > { %349 = vmatmul.mubr.f32.gmra.mrb[6].mxu0 %v186_v4  ;;  %652 = vmatmul.mubr.msk.f32.gmra.mrb[6].mxu1 %vm244_vm0, %v188_v5 }
  0x35   : > { %353 = vmatprep.mubr.f32.mxu0 %v190_v6  ;;  %654 = vmatprep.mubr.msk.f32.mxu1 %vm244_vm0, %v191_v7 }
  0x38   : > { %354 = vmatmul.mubr.f32.gmra.mrb[8].mxu0 %v189_v8  ;;  %655 = vmatmul.mubr.msk.f32.gmra.mrb[8].mxu1 %vm244_vm0, %v194_v9 }
  0x39   : > { %358 = vmatprep.mubr.f32.mxu0 %v193_v10  ;;  %657 = vmatprep.mubr.msk.f32.mxu1 %vm244_vm0, %v197_v11 }
  0x3c   : > { %359 = vmatmul.mubr.f32.gmra.mrb[10].mxu0 %v192_v12  ;;  %658 = vmatmul.mubr.msk.f32.gmra.mrb[10].mxu1 %vm244_vm0, %v200_v13 }
  0xfb   : > { %v604_v14 = vpop.f32.mrb[0].mxu0  ;;  %v622_v15 = vpop.f32.mrb[0].mxu1 }
  0xfc   : > { %v605_v16 = vpop.f32.mrb[1].mxu0  ;;  %v623_v17 = vpop.f32.mrb[1].mxu1 }
  0xfd   : > { %v606_v18 = vadd.f32 %v605_v16, %v604_v14  ;;  %v624_v19 = vadd.f32 %v623_v17, %v622_v15 }
  0xff   : > { %v607_v20 = vpop.f32.mrb[2].mxu0  ;;  %v625_v21 = vpop.f32.mrb[2].mxu1  ;;  %v336_v30 = vadd.f32 %v606_v18, %v561_v24  ;;  %v366_v58 = vadd.f32 %v624_v19, %v561_v24 }
 0x100   : > { %v608_v22 = vpop.f32.mrb[3].mxu0  ;;  %v626_v23 = vpop.f32.mrb[3].mxu1 }
 0x101   : > { %v609_v25 = vadd.f32 %v608_v22, %v607_v20  ;;  %v627_v26 = vadd.f32 %v626_v23, %v625_v21 }
 0x103   : > { %v610_v27 = vpop.f32.mrb[4].mxu0  ;;  %v341_v28 = vadd.f32 %v609_v25, %v561_v24  ;;  %v650_v29 = vpop.f32.mrb[4].mxu1  ;;  %v371_v53 = vadd.f32 %v627_v26, %v561_v24 }
 0x104   : > { %v611_v31 = vpop.f32.mrb[5].mxu0  ;;  %v440_v32 = vpop.f32.mrb[5].mxu1 }
 0x105   : > { %v446_v33 = vadd.f32 %v650_v29, %v341_v28  ;;  %v612_v34 = vadd.f32 %v611_v31, %v610_v27  ;;  %v441_v35 = vadd.f32 %v440_v32, %v336_v30 }
 0x107   : > { %v480_v36 = vmax.f32 %v446_v33, 0.0  ;;  %v479_v37 = vmax.f32 %v441_v35, 0.0  ;;  %v613_v38 = vpop.f32.mrb[6].mxu0  ;;  %v653_v39 = vpop.f32.mrb[6].mxu1  ;;  %v346_v40 = vadd.f32 %v612_v34, %v561_v24 }
 0x108   : > { %v614_v41 = vpop.f32.mrb[7].mxu0  ;;  %v450_v42 = vpop.f32.mrb[7].mxu1 }
 0x109   : > { %489 = vst.msk [vmem:[%s916_s22 + $0x8] sm:$0xff] %vm487_vm1, %v480_v36  ;;  %488 = vst.msk [vmem:[%s916_s22] sm:$0xff] %vm487_vm1, %v479_v37  ;;  %v615_v43 = vadd.f32 %v614_v41, %v613_v38  ;;  %v451_v44 = vadd.f32 %v450_v42, %v346_v40 }
 0x10b   : > { %v351_v45 = vadd.f32 %v615_v43, %v561_v24  ;;  %v481_v46 = vmax.f32 %v451_v44, 0.0  ;;  %v616_v47 = vpop.f32.mrb[8].mxu0  ;;  %v656_v48 = vpop.f32.mrb[8].mxu1 }
 0x10c   : > { %v617_v49 = vpop.f32.mrb[9].mxu0  ;;  %v460_v50 = vpop.f32.mrb[9].mxu1 }
 0x10d   : > { %v456_v51 = vadd.f32 %v653_v39, %v351_v45  ;;  %490 = vst.msk [vmem:[%s916_s22 + $0x10] sm:$0xff] %vm487_vm1, %v481_v46  ;;  %v618_v52 = vadd.f32 %v617_v49, %v616_v47 }
 0x10f   : > { %v482_v54 = vmax.f32 %v456_v51, 0.0  ;;  %v356_v55 = vadd.f32 %v618_v52, %v561_v24  ;;  %v619_v56 = vpop.f32.mrb[10].mxu0  ;;  %v659_v57 = vpop.f32.mrb[10].mxu1 }
 0x110   : > { %v476_v59 = vadd.f32 %v659_v57, %v371_v53  ;;  %v620_v60 = vpop.f32.mrb[11].mxu0  ;;  %v470_v61 = vpop.f32.mrb[11].mxu1 }
 0x111   : > { %491 = vst.msk [vmem:[%s916_s22 + $0x18] sm:$0xff] %vm487_vm1, %v482_v54  ;;  %v461_v62 = vadd.f32 %v460_v50, %v356_v55  ;;  %v621_v63 = vadd.f32 %v620_v60, %v619_v56  ;;  %v471_v0 = vadd.f32 %v470_v61, %v366_v58 }
 0x112   : > { %v486_v1 = vmax.f32 %v476_v59, 0.0 }
 0x113   : > { %v483_v2 = vmax.f32 %v461_v62, 0.0  ;;  %v361_v3 = vadd.f32 %v621_v63, %v561_v24  ;;  %v485_v4 = vmax.f32 %v471_v0, 0.0 }
 0x114   : > { %495 = vst.msk [vmem:[%s916_s22 + $0x38] sm:$0xff] %vm487_vm1, %v486_v1 }
 0x115   : > { %492 = vst.msk [vmem:[%s916_s22 + $0x20] sm:$0xff] %vm487_vm1, %v483_v2  ;;  %v466_v5 = vadd.f32 %v656_v48, %v361_v3  ;;  %494 = vst.msk [vmem:[%s916_s22 + $0x30] sm:$0xff] %vm487_vm1, %v485_v4 }
 0x117   : > { %v484_v6 = vmax.f32 %v466_v5, 0.0 }
 0x119   : > { %493 = vst.msk [vmem:[%s916_s22 + $0x28] sm:$0xff] %vm487_vm1, %v484_v6 }
 0x11a PF: > { %s13_s12 = sadd.s32 1, %s731_s12  }
 0x11b   : > { %p10_p4 = scmp.ge.s32.totalorder %s13_s12, 4  }
 0x11d   :  { %12 = sbr.rel (!%p10_p4) target bundleno = 1 (0x1), region = 62 }

// kernel: abstraction_pipeline_forward.3
= control target key start
LH: loop header
LB: loop body
LE: loop exit
PB: predicated region body
PF: predicated region fallthrough
CT: control target
= control target key end

     0   :  { %s3058_s27 = smov 0   ;;  %s3060_s28 = smov 0   ;;  %s3562_s0 = inlined_call_operand.vmem [shape: f32[2,4,192], index: 0, kind: input, shape index: {}]   ;;  %s3563_s1 = inlined_call_operand.vmem [shape: f32[192,64], index: 1, kind: input, shape index: {}]   ;;  %s3564_s2 = inlined_call_operand.vmem [shape: f32[1,64], index: 2, kind: input, shape index: {}]   ;;  %s3565_s3 = inlined_call_operand.vmem [shape: f32[4,64], index: 3, kind: input, shape index: {}]   ;;  %s3566_s4 = inlined_call_operand.vmem [shape: f32[4,1,64], index: 4, kind: input, shape index: {}]   ;;  %s3567_s5 = inlined_call_operand.vmem [shape: f32[4,1,64], index: 5, kind: input, shape index: {}]   ;;  %s3568_s6 = inlined_call_operand.vmem [shape: f32[4,64,192], index: 6, kind: input, shape index: {}]   ;;  %s3569_s7 = inlined_call_operand.vmem [shape: f32[4,1,192], index: 7, kind: input, shape index: {}]   ;;  %s3570_s8 = inlined_call_operand.vmem [shape: f32[4,64,64], index: 8, kind: input, shape index: {}]   ;;  %s3571_s9 = inlined_call_operand.vmem [shape: f32[4,1,64], index: 9, kind: input, shape index: {}]   ;;  %s3572_s10 = inlined_call_operand.vmem [shape: f32[4,1,64], index: 10, kind: input, shape index: {}]   ;;  %s3573_s11 = inlined_call_operand.vmem [shape: f32[4,1,64], index: 11, kind: input, shape index: {}]   ;;  %s3574_s12 = inlined_call_operand.vmem [shape: f32[4,64,128], index: 12, kind: input, shape index: {}]   ;;  %s3575_s13 = inlined_call_operand.vmem [shape: f32[4,1,128], index: 13, kind: input, shape index: {}]   ;;  %s3576_s14 = inlined_call_operand.vmem [shape: f32[4,128,64], index: 14, kind: input, shape index: {}]   ;;  %s3577_s15 = inlined_call_operand.vmem [shape: f32[4,1,64], index: 15, kind: input, shape index: {}]   ;;  %s3578_s16 = inlined_call_operand.vmem [shape: f32[64,512], index: 16, kind: input, shape index: {}]   ;;  %s3579_s17 = inlined_call_operand.vmem [shape: f32[1,512], index: 17, kind: input, shape index: {}]   ;;  %s3580_s18 = inlined_call_operand.vmem [shape: f32[2,1,512], index: 18, kind: output, shape index: {}]  }
   0x1   :  { %3588 = sst [smem:[#allocation12_spill]] %s3562_s0  ;;  %s3062_s29 = smov 0  }
   0x2   :  { %3589 = sst [smem:[#allocation13_spill]] %s3563_s1  ;;  %s3064_s30 = smov 0  }
   0x3   :  { %3590 = sst [smem:[#allocation14_spill]] %s3564_s2  ;;  %s3066_s0 = smov 0  }
   0x4   :  { %3591 = sst [smem:[#allocation15_spill]] %s3565_s3 }
   0x5   :  { %3592 = sst [smem:[#allocation16_spill]] %s3567_s5 }
   0x6   :  { %3593 = sst [smem:[#allocation17_spill]] %s3568_s6 }
   0x7   :  { %3594 = sst [smem:[#allocation18_spill]] %s3569_s7 }
   0x8   :  { %3595 = sst [smem:[#allocation19_spill]] %s3570_s8 }
   0x9   :  { %3596 = sst [smem:[#allocation20_spill]] %s3578_s16 }
   0xa   :  { %3597 = sst [smem:[#allocation21_spill]] %s3579_s17 }
   0xb   :  { %3598 = sst [smem:[#allocation22_spill]] %s3580_s18 }
   0xc LB: > { %3599 = sst [smem:[#allocation5_spill]] %s2932_s27  ;;  %s37_s19 = sadd.s32 1, %s2940_s29  ;;  %s2948_s0 = sphi %s3066_s0, %s28_s0   ;;  %s2944_s30 = sphi %s3064_s30, %s3630_s30   ;;  %s2940_s29 = sphi %s3062_s29, %s3629_s29   ;;  %s2936_s28 = sphi %s3060_s28, %s3628_s28   ;;  %s2932_s27 = sphi %s3058_s27, %s3627_s27  }
   0xd   : > { %3600 = sst [smem:[#allocation6_spill]] %s2940_s29  ;;  %s40_s1 = sadd.s32 1, %s2944_s30 }
   0xe   : > { %3601 = sst [smem:[#allocation7_spill]] %s2944_s30  ;;  %p38_p0 = scmp.ge.s32.totalorder %s37_s19, 4 }
   0xf   : > { %3602 = sst [smem:[#allocation8_spill]] %s2948_s0  ;;  %p2486_p1 = scmp.ge.s32.totalorder %s2948_s0, 1 }
  0x10   : > { %p629_p2 = scmp.lt.s32.totalorder %s2948_s0, 9  ;;  %s3632_s19 = smov (%p38_p0, %s37_s19), 0 }
  0x11   : > { %3603 = sst [smem:[#allocation9_spill]] %s3632_s19  ;;  %s3634_s1 = smov (!%p38_p0, %s40_s1), %s2944_s30 }
  0x12   : > { %p630_p3 = pnand %p2486_p1, %p629_p2  ;;  %p42_p4 = scmp.ge.s32.totalorder %s3634_s1, 2 }
  0x14   : > { %s3636_s1 = smov (%p42_p4, %s3634_s1), 0  ;;  %633 = sbr.rel (%p630_p3) target bundleno = 3617 (0xe21), region = 92 }
  0x15   : > { %3604 = sst [smem:[#allocation10_spill]] %s3636_s1 }
  0x1b   : > { %p727_p5 = scmp.lt.s32.totalorder %s2936_s28, 1  ;;  %p732_p6 = scmp.lt.s32.totalorder %s2932_s27, 3 }
  0x1c   : > { %s3605_s24 = sld [smem:[#allocation12_spill]]  ;;  %s3607_s6 = sld [smem:[#allocation17_spill]] }
  0x1d   : > { %s3638_s28 = smov (!%p727_p5, %s2936_s28), 1  ;;  %s3608_s7 = sld [smem:[#allocation18_spill]] }
  0x1e   : > { %s3092_s20 = scalar_select %p732_p6, %s2932_s27, 3 }
  0x1f   : > { %s2533_s21 = sshll.u32 %s3638_s28, 3  ;;  %s2498_s22 = sshll.u32 %s3638_s28, 2 }
  0x20   : > { %s2534_s17 = sshll.u32 %s3092_s20, 7  ;;  %s2491_s28 = sshll.u32 %s3092_s20, 1 }
  0x21   : > { %s2535_s23 = sshll.u32 %s3092_s20, 6  ;;  %s3609_s8 = sld [smem:[#allocation19_spill]] }
  0x22   : > { %s3097_s25 = scalar_lea.vmem %s3605_s24, %s2533_s21  ;;  %s3111_s27 = scalar_lea.vmem %s3607_s6, %s2534_s17 }
  0x23   : > { %s3117_s21 = scalar_lea.vmem %s3608_s7, %s2491_s28  ;;  %s3140_s7 = scalar_lea.vmem %s3574_s12, %s2535_s23 }
  0x24   : > { %s3149_s30 = scalar_lea.vmem %s3576_s14, %s2534_s17  ;;  %s776_s16 = scalar_lea.vmem %s3577_s15, %s3092_s20 }
  0x25   : > { %s3611_s18 = sld [smem:[#allocation22_spill]] }
  0x27   : > { %s3123_s26 = scalar_lea.vmem %s3609_s8, %s2535_s23  ;;  %s768_s8 = scalar_lea.vmem %s3575_s13, %s3092_s20 }
  0x28   : > { %3610 = sst [smem:[#allocation11_spill]] %s3123_s26  ;;  %s3612_s23 = sld [smem:[#allocation5_spill]] }
  0x2b   : > { %s3158_s0 = scalar_lea.vmem %s3611_s18, %s2498_s22 }
  0x2e   : > { %p2499_p7 = scmp.ne.s32.totalorder %s3612_s23, 0 }
  0x2f   : > { %s3613_s24 = sld [smem:[#allocation13_spill]] (!%p2499_p7)  ;;  %v2950_v3 = vmov (!%p2499_p7), 0.0|0.0   ;;  %v785_v12 = vld [vmem:[%s3097_s25] sm:$0xff] (!%p2499_p7)  ;;  %vm819_vm0 = vcmask (!%p2499_p7), 523264   ;;  %s3614_s25 = sld [smem:[#allocation14_spill]] (!%p2499_p7)  ;;  %vm894_vm1 = vcmask (!%p2499_p7), 519168  }
  0x30   : > { %784 = sbr.rel (%p2499_p7) target bundleno = 320 (0x140), region = 96  ;;  %2702 = vmatprep.subr.bf16.mxu0 (!%p2499_p7), %v2950_v3  ;;  %v818_v13 = vcombine.high (!%p2499_p7), %v785_v12, %v785_v12  ;;  %s3615_s6 = sld [smem:[#allocation15_spill]] (!%p2499_p7) }
  0x32   : > { %2501 = vmatprep.mubr.msk.f32.mxu0 (!%p2499_p7), %vm819_vm0, %v818_v13 }
  0x35   : > { %v786_v0 = vld [vmem:[%s3613_s24] sm:$0xff] (!%p2499_p7)  ;;  %v787_v1 = vld [vmem:[%s3613_s24 + $0x8] sm:$0xff] (!%p2499_p7)  ;;  %v788_v2 = vld [vmem:[%s3613_s24 + $0x10] sm:$0xff] (!%p2499_p7) }
  0x36   : > { %v2703_v4 = vpack.c.bf16 (!%p2499_p7), %v787_v1, %v786_v0  ;;  %v789_v5 = vld [vmem:[%s3613_s24 + $0x18] sm:$0xff] (!%p2499_p7)  ;;  %v790_v7 = vld [vmem:[%s3613_s24 + $0x20] sm:$0xff] (!%p2499_p7)  ;;  %v791_v8 = vld [vmem:[%s3613_s24 + $0x28] sm:$0xff] (!%p2499_p7) }
  0x37   : > { %v2706_v6 = vpack.c.bf16 %v789_v5, %v788_v2  ;;  %v2709_v9 = vpack.c.bf16 %v791_v8, %v790_v7  ;;  %v792_v10 = vld [vmem:[%s3613_s24 + $0x30] sm:$0xff]  ;;  %v793_v11 = vld [vmem:[%s3613_s24 + $0x38] sm:$0xff]  ;;  %v794_v15 = vld [vmem:[%s3613_s24 + $0x40] sm:$0xff] }
  0x38   : > { %2704 = vmatpush1.bf16.msra.mxu0 %v2703_v4  ;;  %v2712_v14 = vpack.c.bf16 %v793_v11, %v792_v10  ;;  %v795_v16 = vld [vmem:[%s3613_s24 + $0x48] sm:$0xff]  ;;  %v796_v18 = vld [vmem:[%s3613_s24 + $0x50] sm:$0xff]  ;;  %v797_v19 = vld [vmem:[%s3613_s24 + $0x58] sm:$0xff] }
  0x39   : > { %2705 = vmatprep.subr.bf16.mxu0 %v2950_v3  ;;  %v2715_v17 = vpack.c.bf16 %v795_v16, %v794_v15  ;;  %v2718_v20 = vpack.c.bf16 %v797_v19, %v796_v18  ;;  %v798_v21 = vld [vmem:[%s3613_s24 + $0x60] sm:$0xff]  ;;  %v799_v22 = vld [vmem:[%s3613_s24 + $0x68] sm:$0xff]  ;;  %v800_v24 = vld [vmem:[%s3613_s24 + $0x70] sm:$0xff] }
  0x3a   : > { %v2721_v23 = vpack.c.bf16 %v799_v22, %v798_v21  ;;  %v801_v25 = vld [vmem:[%s3613_s24 + $0x78] sm:$0xff]  ;;  %v802_v27 = vld [vmem:[%s3613_s24 + $0x80] sm:$0xff]  ;;  %v803_v28 = vld [vmem:[%s3613_s24 + $0x88] sm:$0xff] }
  0x3b   : > { %v2724_v26 = vpack.c.bf16 %v801_v25, %v800_v24  ;;  %v2727_v29 = vpack.c.bf16 %v803_v28, %v802_v27  ;;  %v804_v30 = vld [vmem:[%s3613_s24 + $0x90] sm:$0xff]  ;;  %v805_v31 = vld [vmem:[%s3613_s24 + $0x98] sm:$0xff]  ;;  %v806_v33 = vld [vmem:[%s3613_s24 + $0xa0] sm:$0xff] }
  0x3c   : > { %2707 = vmatpush1.bf16.msra.mxu0 %v2706_v6  ;;  %v2730_v32 = vpack.c.bf16 %v805_v31, %v804_v30  ;;  %v807_v34 = vld [vmem:[%s3613_s24 + $0xa8] sm:$0xff]  ;;  %v808_v36 = vld [vmem:[%s3613_s24 + $0xb0] sm:$0xff]  ;;  %v809_v37 = vld [vmem:[%s3613_s24 + $0xb8] sm:$0xff] }
  0x3d   : > { %2708 = vmatprep.subr.bf16.mxu0 %v2950_v3  ;;  %v2733_v35 = vpack.c.bf16 %v807_v34, %v806_v33  ;;  %v2736_v38 = vpack.c.bf16 %v809_v37, %v808_v36  ;;  %v2500_v39 = vld [vmem:[%s3614_s25] ss:$0 sm:$0xff] }
  0x3e   : > { %v892_v41 = vld [vmem:[%s3615_s6] sm:$0xf] }
  0x40   : > { %2710 = vmatpush1.bf16.msra.mxu0 %v2709_v9 }
  0x41   : > { %2711 = vmatprep.subr.bf16.mxu0 %v2950_v3 }
  0x44   : > { %2713 = vmatpush1.bf16.msra.mxu0 %v2712_v14 }
  0x45   : > { %2714 = vmatprep.subr.bf16.mxu0 %v2950_v3 }
  0x48   : > { %2716 = vmatpush1.bf16.msra.mxu0 %v2715_v17 }
  0x49   : > { %2717 = vmatprep.subr.bf16.mxu0 %v2950_v3 }
  0x4c   : > { %2719 = vmatpush1.bf16.msra.mxu0 %v2718_v20 }
  0x4d   : > { %2720 = vmatprep.subr.bf16.mxu0 %v2950_v3 }
  0x50   : > { %2722 = vmatpush1.bf16.msra.mxu0 %v2721_v23 }
  0x51   : > { %2723 = vmatprep.subr.bf16.mxu0 %v2950_v3 }
  0x54   : > { %2725 = vmatpush1.bf16.msra.mxu0 %v2724_v26 }
  0x55   : > { %2726 = vmatprep.subr.bf16.mxu0 %v2950_v3 }
  0x58   : > { %2728 = vmatpush1.bf16.msra.mxu0 %v2727_v29 }
  0x59   : > { %2729 = vmatprep.subr.bf16.mxu0 %v2950_v3 }
  0x5c   : > { %2731 = vmatpush1.bf16.msra.mxu0 %v2730_v32 }
  0x5d   : > { %2732 = vmatprep.subr.bf16.mxu0 %v2950_v3 }
  0x60   : > { %2734 = vmatpush1.bf16.msra.mxu0 %v2733_v35 }
  0x61   : > { %2735 = vmatprep.subr.bf16.mxu0 %v2950_v3 }
  0x64   : > { %2737 = vmatpush1.bf16.msra.mxu0 %v2736_v38 }
  0x67   : > { %887 = vmatmul.mubr.f32.vlgmr.msra.gmra.mrb[0].mxu0 %v785_v12 }
 0x13a   : > { %v888_v40 = vpop.f32.mrb[0].mxu0 }
 0x13b   : > { %v889_v42 = vadd.f32 %v2500_v39, %v888_v40  ;;  %v890_v43 = vpop.f32.mrb[1].mxu0 }
 0x13d   : > { %v893_v44 = vadd.f32 %v892_v41, %v889_v42 }
 0x13f   : > { %895 = vst.msk [vmem:[#allocation2] sm:$0xf] %vm894_vm1, %v893_v44 }
 0x140 PF: > { %vm899_vm2 = vcmask 519168   ;;  %v929_v52 = vld [vmem:[%s3111_s27 + $0x8] sm:$0xff]  ;;  %v931_v53 = vld [vmem:[%s3111_s27 + $0x18] sm:$0xff]  ;;  %v928_v55 = vld [vmem:[%s3111_s27] sm:$0xff]  ;;  %v2951_v1 = vmov 0.0   ;;  %s3616_s2 = scalar_lea.vmem %s3566_s4, %s3092_s20  ;;  %s3617_s26 = sld [smem:[#allocation16_spill]]  ;;  %v946_v22 = vlaneseq }
 0x141   : > { %v2738_v54 = vpack.c.bf16 %v931_v53, %v929_v52  ;;  %v930_v56 = vld [vmem:[%s3111_s27 + $0x10] sm:$0xff]  ;;  %v933_v58 = vld [vmem:[%s3111_s27 + $0x28] sm:$0xff]  ;;  %v935_v59 = vld [vmem:[%s3111_s27 + $0x38] sm:$0xff]  ;;  %1024 = vmatprep.mubr.f32.mxu1 %v2951_v1  ;;  %2609 = vmatprep.subr.mxu0 %v2951_v1  ;;  %vm956_vm3 = vcmask 523264   ;;  %vm1035_vm4 = vcmask 1043456   ;;  %vm1036_vm5 = vcmask 523268   ;;  %s3620_s28 = scalar_lea.vmem %s3571_s9, %s3092_s20 }
 0x142   : > { %v2740_v57 = vpack.c.bf16 %v930_v56, %v928_v55  ;;  %v932_v60 = vld [vmem:[%s3111_s27 + $0x20] sm:$0xff]  ;;  %v2742_v61 = vpack.c.bf16 %v935_v59, %v933_v58  ;;  %v934_v62 = vld [vmem:[%s3111_s27 + $0x30] sm:$0xff]  ;;  %v937_v63 = vld [vmem:[%s3111_s27 + $0x48] sm:$0xff]  ;;  %v3277_v23 = vshrl.u32 %v946_v22, 7  ;;  %vm2952_vm6 = vmmov 0   ;;  %s2954_s29 = smov 64  }
 0x143   : > { %2739 = vmatprep.subr.bf16.mxu1 %v2738_v54  ;;  %v939_v0 = vld [vmem:[%s3111_s27 + $0x58] sm:$0xff]  ;;  %v2744_v2 = vpack.c.bf16 %v934_v62, %v932_v60  ;;  %v936_v4 = vld [vmem:[%s3111_s27 + $0x40] sm:$0xff]  ;;  %v938_v5 = vld [vmem:[%s3111_s27 + $0x50] sm:$0xff]  ;;  %2611 = vmatprep.mubr.msk.f32.mxu0 %vm2952_vm6, %v2951_v1  ;;  %s2955_s22 = smov 112   ;;  %vm1044_vm8 = vcmask 130048   ;;  %vm1119_vm9 = vcmask 27648  }
 0x144   : > { %2741 = vmatpush1.bf16.msra.mxu1 %v2740_v57  ;;  %v2746_v3 = vpack.c.bf16 %v939_v0, %v937_v63  ;;  %v941_v6 = vld [vmem:[%s3111_s27 + $0x68] sm:$0xff]  ;;  %v943_v7 = vld [vmem:[%s3111_s27 + $0x78] sm:$0xff]  ;;  %v2748_v8 = vpack.c.bf16 %v938_v5, %v936_v4  ;;  %v940_v10 = vld [vmem:[%s3111_s27 + $0x60] sm:$0xff]  ;;  %v948_v24 = vsub.s32 0, %v3277_v23  ;;  %v952_v26 = vsub.s32 1, %v3277_v23  ;;  %s2956_s18 = smov 96  }
 0x145   : > { %2743 = vmatprep.subr.bf16.mxu1 %v2742_v61  ;;  %v2750_v9 = vpack.c.bf16 %v943_v7, %v941_v6  ;;  %v942_v11 = vld [vmem:[%s3111_s27 + $0x70] sm:$0xff]  ;;  %v2502_v17 = vld [vmem:[%s3616_s2] ss:$0 sm:$0xff]  ;;  %vm1037_vm7 = vmor %vm1036_vm5, %vm1035_vm4  ;;  %s2957_s19 = smov 32   ;;  %s2958_s25 = smov 16   ;;  %vm1131_vm10 = vcmask 31744  }
 0x146   : > { %v3240_v45 = vld [vmem:[#allocation2] sm:$0xf]  ;;  %v2752_v12 = vpack.c.bf16 %v942_v11, %v940_v10  ;;  %s3618_s17 = scalar_lea.vmem %s3617_s26, %s3092_s20  ;;  %s2959_s3 = smov 80   ;;  %vm1208_vm11 = vcmask 125952   ;;  %vm1384_vm12 = vcmask 257152   ;;  %vm1560_vm13 = vcmask 388352  }
 0x147   : > { %v900_v46 = vsel %vm899_vm2, %v3240_v45, 0.0  ;;  %v2503_v19 = vld [vmem:[%s3618_s17] ss:$0 sm:$0xff]  ;;  %s3619_s5 = sld [smem:[#allocation11_spill]]  ;;  %vm1736_vm14 = vcmask 519552   ;;  %s3622_s17 = scalar_lea.vmem %s3573_s11, %s3092_s20 }
 0x148   : > { %901 = vadd.xlane.f32.xlu0 %v900_v46  ;;  %2745 = vmatpush1.bf16.msra.mxu1 %v2744_v2  ;;  %v944_v25 = vld [vmem:[%s3117_s21] sm:$0x3]  ;;  %s2953_s21 = smov 48  }
 0x149   : > { %2747 = vmatprep.subr.bf16.mxu1 %v2746_v3  ;;  %v949_v27 = vrot.slane %v944_v25, %v948_v24  ;;  %v953_v28 = vrot.slane %v944_v25, %v952_v26 }
 0x14c   : > { %2749 = vmatpush1.bf16.msra.mxu1 %v2748_v8 }
 0x14d   : > { %2751 = vmatprep.subr.bf16.mxu1 %v2750_v9 }
 0x150   : > { %2753 = vmatpush1.bf16.msra.mxu1 %v2752_v12 }
 0x151   : > { %2589 = vmatprep.subr.mxu1 %v2951_v1 }
 0x1d5   : > { %v902_v47 = vpop.xlane.xlu0 %901 }
 0x1d6   : > { %v904_v48 = vmul.f32 0.015625, %v902_v47 }
 0x1d8   : > { %v905_v49 = vsub.f32 %v3240_v45, %v904_v48 }
 0x1da   : > { %v906_v50 = vmul.f32 %v905_v49, %v905_v49 }
 0x1dc   : > { %v907_v51 = vsel %vm899_vm2, %v906_v50, 0.0 }
 0x1dd   : > { %908 = vadd.xlane.f32.xlu0 %v907_v51 }
 0x26a   : > { %v909_v13 = vpop.xlane.xlu0 %908 }
 0x26b   : > { %v910_v14 = vmul.f32 0.015625, %v909_v13 }
 0x26d   : > { %v911_v15 = vadd.f32 1e-05, %v910_v14 }
 0x26f   : > { %2888 = vrsqrt.f32 %v911_v15 }
 0x279   : > { %v2889_v16 = vpop.eup %2888 }
 0x27a   : > { %v913_v18 = vmul.f32 %v2889_v16, %v905_v49 }
 0x27c   : > { %v920_v20 = vmul.f32 %v2502_v17, %v913_v18 }
 0x27e   : > { %v927_v21 = vadd.f32 %v2503_v19, %v920_v20 }
 0x280   : > { %2504 = vmatmul.mubr.msk.f32.vlgmr.msra.gmra.mrb[0].mxu1 %vm956_vm3, %v927_v21 }
 0x281   : > { %2591 = vmatprep.mubr.msk.f32.mxu1 %vm2952_vm6, %v2951_v1 }
 0x353   : > { %v1026_v29 = vpop.f32.mrb[0].mxu1 }
 0x354   : > { %v1027_v30 = vadd.f32 %v1026_v29, %v949_v27  ;;  %v1028_v31 = vpop.f32.mrb[1].mxu1 }
 0x355   : > { %v1029_v32 = vadd.f32 %v1028_v31, %v953_v28 }
 0x357   : > { %v1033_v33 = vcombine.low %v1027_v30, %v1029_v32 }
 0x359   : > { %1038 = vst.msk [vmem:[#allocation4] sm:$0xff] %vm1037_vm7, %v1033_v33 }
 0x360   : > { %v1210_v34 = vld [vmem:[#allocation4] sm:$0xf]  ;;  %v1040_v37 = vld [vmem:[#allocation4 + $0x4] sm:$0xf] }
 0x361   : > { %v1039_v35 = vld [vmem:[#allocation4] sm:$0xf]  ;;  %1215 = vrot.lane.b32.xlu0 %v1210_v34, %s2953_s21  ;;  %v1211_v6 = vld [vmem:[#allocation4 + $0x4] sm:$0xf] }
 0x362   : > { %1042 = vrot.lane.b32.xlu1 %v1039_v35, %s2954_s29  ;;  %v1386_v41 = vld [vmem:[#allocation4] sm:$0xf]  ;;  %v1563_v7 = vld [vmem:[#allocation4 + $0x4] sm:$0xf] }
 0x363   : > { %v1562_v48 = vld [vmem:[#allocation4] sm:$0xf]  ;;  %v1387_v28 = vld [vmem:[#allocation4 + $0x4] sm:$0xf] }
 0x365   : > { %1213 = vrot.lane.b32.xlu0 %v1210_v34, %s2955_s22 }
 0x3d3   : > { %v1216_v49 = vpop.permute.xlu0 %1215 }
 0x3d4   : > { %v1043_v36 = vpop.permute.xlu1 %1042 }
 0x3d5   : > { %2590 = vmatpush3.xpose.msk.msra.mxu1 %vm1044_vm8, %v1043_v36 }
 0x3d6   : > { %2594 = vmatprep.subr.mxu1 %v2951_v1 }
 0x3d7   : > { %v1214_v50 = vpop.permute.xlu0 %1213 }
 0x3d8   : > { %2592 = vmatmul.mubr.msk.f32.vlgmr.msra.gmra.mrb[2].mxu1 %vm1044_vm8, %v1039_v35 }
 0x3d9   : > { %2595 = vmatpush3.msk.msra.mxu1 %vm1035_vm4, %v1040_v37  ;;  %2596 = vmatprep.mubr.msk.f32.mxu1 %vm2952_vm6, %v2951_v1 }
 0x3da   : > { %2599 = vmatprep.subr.mxu1 %v2951_v1 }
 0x4ab   : > { %v1115_v38 = vpop.f32.mrb[2].mxu1 }
 0x4ac   : > { %v2593_v39 = vpop.f32.mrb[3].mxu1  ;;  %v1120_v40 = vsel %vm1119_vm9, %v1115_v38, -inf }
 0x4ad   : > { %1121 = vmax.xlane.f32.xlu1 %v1120_v40  ;;  %v1739_v40 = vld [vmem:[%s3619_s5] sm:$0xff] }
 0x4be   : > { %1389 = vrot.lane.b32.xlu1 %v1386_v41, %s2956_s18 }
 0x53a   : > { %v1122_v42 = vpop.xlane.xlu1 %1121 }
 0x53b   : > { %v1123_v43 = vsub.f32 %v1115_v38, %v1122_v42  ;;  %v2960_v42 = vmov 0.0|0.0  }
 0x53d   : > { %v1124_v44 = vmul.f32 1.442695, %v1123_v43 }
 0x53e   : > { %v1390_v53 = vpop.permute.xlu1 %1389 }
 0x53f   : > { %2890 = vpow2.f32 %v1124_v44  ;;  %v1741_v44 = vld [vmem:[%s3619_s5 + $0x10] sm:$0xff] }
 0x549   : > { %v2891_v46 = vpop.eup %2890 }
 0x54a   : > { %v1126_v47 = vsel %vm1119_vm9, %v2891_v46, 0.0 }
 0x54b   : > { %1127 = vadd.xlane.f32.xlu0 %v1126_v47 }
 0x561   : > { %1391 = vrot.lane.b32.xlu0 %v1386_v41, %s2957_s19  ;;  %v1740_v41 = vld [vmem:[%s3619_s5 + $0x8] sm:$0xff] }
 0x562   : > { %v2755_v43 = vpack.c.bf16 %v1740_v41, %v1739_v40  ;;  %v1958_v41 = vld [vmem:[%s3149_s30 + $0x20] sm:$0xff] }
 0x565   : > { %1567 = vrot.lane.b32.xlu0 %v1562_v48, %s2958_s25 }
 0x569   : > { %1565 = vrot.lane.b32.xlu0 %v1562_v48, %s2959_s3  ;;  %v1743_v48 = vld [vmem:[%s3619_s5 + $0x20] sm:$0xff] }
 0x5d8   : > { %v1128_v51 = vpop.xlane.xlu0 %1127 }
 0x5d9   : > { %2892 = vrcp.f32 %v1128_v51 }
 0x5dc   : > { %v1392_v52 = vpop.permute.xlu0 %1391 }
 0x5dd   : > { %2610 = vmatpush3.xpose.msk.msra.mxu0 %vm1044_vm8, %v1392_v52  ;;  %v1746_v52 = vld [vmem:[%s3619_s5 + $0x38] sm:$0xff] }
 0x5de   : > { %2619 = vmatprep.subr.mxu0 %v2951_v1 }
 0x5e0   : > { %v1568_v54 = vpop.permute.xlu0 %1567  ;;  %2612 = vmatmul.mubr.msk.f32.vlgmr.msra.gmra.mrb[0].mxu0 %vm1044_vm8, %v1390_v53 }
 0x5e1   : > { %2620 = vmatpush3.xpose.msk.msra.mxu0 %vm1044_vm8, %v1568_v54  ;;  %2621 = vmatprep.mubr.msk.f32.mxu0 %vm2952_vm6, %v2951_v1 }
 0x5e2   : > { %2754 = vmatprep.subr.bf16.mxu0 %v2960_v42 }
 0x5e3   : > { %v2893_v55 = vpop.eup %2892 }
 0x5e4   : > { %v1130_v56 = vmul.f32 %v2893_v55, %v2891_v46  ;;  %v1566_v57 = vpop.permute.xlu0 %1565  ;;  %v1742_v46 = vld [vmem:[%s3619_s5 + $0x18] sm:$0xff] }
 0x5e5   : > { %2622 = vmatmul.mubr.msk.f32.vlgmr.msra.gmra.mrb[2].mxu0 %vm1044_vm8, %v1566_v57  ;;  %v2758_v47 = vpack.c.bf16 %v1742_v46, %v1741_v44  ;;  %v1960_v46 = vld [vmem:[%s3149_s30 + $0x30] sm:$0xff] }
 0x5e6   : > { %2597 = vmatmul.mubr.msk.f32.vlgmr.msra.gmra.mrb[4].mxu1 %vm1131_vm10, %v1130_v56  ;;  %2645 = vmatprep.mubr.msk.f32.mxu0 %vm2952_vm6, %v2951_v1 }
 0x5e7   : > { %2600 = vmatpush3.xpose.msk.msra.mxu1 %vm1044_vm8, %v1216_v49  ;;  %2601 = vmatprep.mubr.msk.f32.mxu1 %vm2952_vm6, %v2951_v1  ;;  %v1744_v49 = vld [vmem:[%s3619_s5 + $0x28] sm:$0xff] }
 0x5e8   : > { %2604 = vmatprep.subr.mxu1 %v2951_v1  ;;  %2756 = vmatpush3.bf16.msra.mxu0 %v2755_v43  ;;  %v2761_v51 = vpack.c.bf16 %v1744_v49, %v1743_v48  ;;  %v1959_v43 = vld [vmem:[%s3149_s30 + $0x28] sm:$0xff]  ;;  %v1962_v49 = vld [vmem:[%s3149_s30 + $0x40] sm:$0xff] }
 0x5e9   : > { %2757 = vmatprep.subr.bf16.mxu0 %v2960_v42  ;;  %v2785_v44 = vpack.c.bf16 %v1959_v43, %v1958_v41 }
 0x5ea   : > { %2602 = vmatmul.mubr.msk.f32.vlgmr.msra.gmra.mrb[6].mxu1 %vm1044_vm8, %v1214_v50  ;;  %v1745_v50 = vld [vmem:[%s3619_s5 + $0x30] sm:$0xff] }
 0x5eb   : > { %2606 = vmatprep.mubr.msk.f32.mxu1 %vm2952_vm6, %v2951_v1  ;;  %v2764_v53 = vpack.c.bf16 %v1746_v52, %v1745_v50  ;;  %v1963_v50 = vld [vmem:[%s3149_s30 + $0x48] sm:$0xff]  ;;  %v1964_v52 = vld [vmem:[%s3149_s30 + $0x50] sm:$0xff] }
 0x5ec   : > { %2759 = vmatpush3.bf16.msra.mxu0 %v2758_v47  ;;  %v1961_v47 = vld [vmem:[%s3149_s30 + $0x38] sm:$0xff] }
 0x5ed   : > { %2760 = vmatprep.subr.bf16.mxu0 %v2960_v42  ;;  %v2788_v48 = vpack.c.bf16 %v1961_v47, %v1960_v46 }
 0x5f0   : > { %2762 = vmatpush3.bf16.msra.mxu0 %v2761_v51  ;;  %v2791_v51 = vpack.c.bf16 %v1963_v50, %v1962_v49 }
 0x5f1   : > { %2763 = vmatprep.subr.bf16.mxu0 %v2960_v42 }
 0x5f4   : > { %2765 = vmatpush3.bf16.msra.mxu0 %v2764_v53  ;;  %v1965_v53 = vld [vmem:[%s3149_s30 + $0x58] sm:$0xff] }
 0x5f5   : > { %2778 = vmatprep.subr.bf16.mxu0 %v2960_v42 }
 0x6b3   : > { %v1463_v58 = vpop.f32.mrb[0].mxu0 }
 0x6b4   : > { %v2613_v59 = vpop.f32.mrb[1].mxu0  ;;  %v1467_v60 = vsel %vm1119_vm9, %v1463_v58, -inf }
 0x6b5   : > { %1468 = vmax.xlane.f32.xlu1 %v1467_v60 }
 0x6b8   : > { %v1639_v61 = vpop.f32.mrb[2].mxu0 }
 0x6b9   : > { %v1204_v62 = vpop.f32.mrb[4].mxu1  ;;  %v2623_v63 = vpop.f32.mrb[3].mxu0  ;;  %v1643_v5 = vsel %vm1119_vm9, %v1639_v61, -inf }
 0x6ba   : > { %1209 = vst.msk [vmem:[#allocation3] sm:$0xf] %vm1208_vm11, %v1204_v62  ;;  %v2598_v0 = vpop.f32.mrb[5].mxu1 }
 0x6bb   : > { %v2521_v0 = vld [vmem:[%s3620_s28] ss:$0 sm:$0xff] }
 0x6bd   : > { %v1287_v2 = vpop.f32.mrb[6].mxu1 }
 0x6be   : > { %v2603_v3 = vpop.f32.mrb[7].mxu1  ;;  %v1291_v4 = vsel %vm1119_vm9, %v1287_v2, -inf }
 0x6bf   : > { %1292 = vmax.xlane.f32.xlu0 %v1291_v4 }
 0x6c3   : > { %1644 = vmax.xlane.f32.xlu0 %v1643_v5 }
 0x6c6   : > { %1303 = vrot.lane.b32.xlu1 %v1211_v6, %s2955_s22 }
 0x6ca   : > { %1655 = vrot.lane.b32.xlu1 %v1563_v7, %s2959_s3 }
 0x742   : > { %v1469_v8 = vpop.xlane.xlu1 %1468 }
 0x743   : > { %v1470_v9 = vsub.f32 %v1463_v58, %v1469_v8 }
 0x745   : > { %v1471_v10 = vmul.f32 1.442695, %v1470_v9 }
 0x746   : > { %v1304_v11 = vpop.permute.xlu1 %1303 }
 0x747   : > { %2894 = vpow2.f32 %v1471_v10  ;;  %2605 = vmatpush3.msk.msra.mxu1 %vm1035_vm4, %v1304_v11  ;;  %v1857_v11 = vld [vmem:[%s3140_s7] sm:$0xff] }
 0x748   : > { %2614 = vmatprep.subr.mxu1 %v2951_v1 }
 0x74a   : > { %v1656_v38 = vpop.permute.xlu1 %1655 }
 0x74c   : > { %v1293_v12 = vpop.xlane.xlu0 %1292 }
 0x74d   : > { %v1294_v13 = vsub.f32 %v1287_v2, %v1293_v12  ;;  %v1858_v12 = vld [vmem:[%s3140_s7 + $0x8] sm:$0xff] }
 0x74f   : > { %v1295_v18 = vmul.f32 1.442695, %v1294_v13  ;;  %v1859_v13 = vld [vmem:[%s3140_s7 + $0x10] sm:$0xff] }
 0x750   : > { %v1645_v14 = vpop.xlane.xlu0 %1644 }
 0x751   : > { %v2895_v15 = vpop.eup %2894  ;;  %v1646_v16 = vsub.f32 %v1639_v61, %v1645_v14  ;;  %v1860_v14 = vld [vmem:[%s3140_s7 + $0x18] sm:$0xff] }
 0x752   : > { %v1473_v17 = vsel %vm1119_vm9, %v2895_v15, 0.0 }
 0x753   : > { %v1647_v19 = vmul.f32 1.442695, %v1646_v16  ;;  %1474 = vadd.xlane.f32.xlu0 %v1473_v17  ;;  %v1861_v16 = vld [vmem:[%s3140_s7 + $0x20] sm:$0xff]  ;;  %v1862_v17 = vld [vmem:[%s3140_s7 + $0x28] sm:$0xff] }
 0x755   : > { %2896 = vpow2.f32 %v1647_v19  ;;  %v1863_v19 = vld [vmem:[%s3140_s7 + $0x30] sm:$0xff] }
 0x756   : > { %2898 = vpow2.f32 %v1295_v18  ;;  %v2773_v18 = vpack.c.bf16 %v1862_v17, %v1861_v16 }
 0x75f   : > { %v2897_v20 = vpop.eup %2896 }
 0x760   : > { %v1649_v21 = vsel %vm1119_vm9, %v2897_v20, 0.0  ;;  %v2899_v25 = vpop.eup %2898 }
 0x761   : > { %1650 = vadd.xlane.f32.xlu0 %v1649_v21  ;;  %v1297_v27 = vsel %vm1119_vm9, %v2899_v25, 0.0 }
 0x765   : > { %1298 = vadd.xlane.f32.xlu0 %v1297_v27  ;;  %v1955_v27 = vld [vmem:[%s3149_s30 + $0x8] sm:$0xff] }
 0x77b   : > { %1479 = vrot.lane.b32.xlu0 %v1387_v28, %s2956_s18 }
 0x7e0   : > { %v1475_v29 = vpop.xlane.xlu0 %1474 }
 0x7ee   : > { %v1651_v30 = vpop.xlane.xlu0 %1650 }
 0x7f2   : > { %v1299_v31 = vpop.xlane.xlu0 %1298 }
 0x7f3   : > { %2900 = vrcp.f32 %v1299_v31 }
 0x7f4   : > { %2902 = vrcp.f32 %v1475_v29 }
 0x7f5   : > { %2904 = vrcp.f32 %v1651_v30 }
 0x7f6   : > { %v1480_v35 = vpop.permute.xlu0 %1479 }
 0x7fd   : > { %v2901_v32 = vpop.eup %2900 }
 0x7fe   : > { %v1301_v33 = vmul.f32 %v2901_v32, %v2899_v25  ;;  %v2903_v34 = vpop.eup %2902  ;;  %v1954_v25 = vld [vmem:[%s3149_s30] sm:$0xff] }
 0x7ff   : > { %v1477_v36 = vmul.f32 %v2903_v34, %v2895_v15  ;;  %v2905_v37 = vpop.eup %2904  ;;  %v2770_v15 = vpack.c.bf16 %v1860_v14, %v1859_v13  ;;  %v2779_v28 = vpack.c.bf16 %v1955_v27, %v1954_v25 }
 0x800   : > { %2607 = vmatmul.mubr.msk.f32.vlgmr.msra.gmra.mrb[8].mxu1 %vm1131_vm10, %v1301_v33  ;;  %v1653_v39 = vmul.f32 %v2905_v37, %v2897_v20  ;;  %v1864_v20 = vld [vmem:[%s3140_s7 + $0x38] sm:$0xff]  ;;  %s3621_s7 = scalar_lea.vmem %s3572_s10, %s3092_s20 }
 0x801   : > { %2615 = vmatpush3.msk.msra.mxu1 %vm1035_vm4, %v1480_v35  ;;  %2616 = vmatprep.mubr.msk.f32.mxu1 %vm2952_vm6, %v2951_v1  ;;  %v2776_v21 = vpack.c.bf16 %v1864_v20, %v1863_v19  ;;  %v2523_v33 = vld [vmem:[%s3621_s7] ss:$0 sm:$0xff] }
 0x802   : > { %2624 = vmatprep.subr.mxu1 %v2951_v1  ;;  %v2524_v35 = vld [vmem:[%s3622_s17] ss:$0 sm:$0xff] }
 0x804   : > { %2617 = vmatmul.mubr.msk.f32.vlgmr.msra.gmra.mrb[10].mxu1 %vm1131_vm10, %v1477_v36 }
 0x805   : > { %2625 = vmatpush3.msk.msra.mxu1 %vm1035_vm4, %v1656_v38  ;;  %2626 = vmatprep.mubr.msk.f32.mxu1 %vm2952_vm6, %v2951_v1  ;;  %v1956_v38 = vld [vmem:[%s3149_s30 + $0x10] sm:$0xff] }
 0x806   : > { %2766 = vmatprep.subr.bf16.mxu1 %v2960_v42 }
 0x808   : > { %2627 = vmatmul.mubr.msk.f32.vlgmr.msra.gmra.mrb[12].mxu1 %vm1131_vm10, %v1653_v39  ;;  %v1957_v39 = vld [vmem:[%s3149_s30 + $0x18] sm:$0xff] }
 0x809   : > { %2664 = vmatprep.mubr.msk.f32.mxu1 %vm2952_vm6, %v2951_v1  ;;  %v2782_v40 = vpack.c.bf16 %v1957_v39, %v1956_v38 }
 0x8d3   : > { %v1376_v54 = vpop.f32.mrb[8].mxu1 }
 0x8d4   : > { %1381 = vrot.lane.b32.xlu1 %v1376_v54, %s2958_s25  ;;  %v2608_v55 = vpop.f32.mrb[9].mxu1  ;;  %v2794_v54 = vpack.c.bf16 %v1965_v53, %v1964_v52 }
 0x8d5   : > { %v1966_v55 = vld [vmem:[%s3149_s30 + $0x60] sm:$0xff] }
 0x8d7   : > { %v1552_v56 = vpop.f32.mrb[10].mxu1 }
 0x8d8   : > { %1557 = vrot.lane.b32.xlu1 %v1552_v56, %s2957_s19  ;;  %v2618_v57 = vpop.f32.mrb[11].mxu1  ;;  %v1967_v56 = vld [vmem:[%s3149_s30 + $0x68] sm:$0xff] }
 0x8d9   : > { %v2797_v57 = vpack.c.bf16 %v1967_v56, %v1966_v55 }
 0x8db   : > { %v1728_v58 = vpop.f32.mrb[12].mxu1 }
 0x8dc   : > { %1733 = vrot.lane.b32.xlu0 %v1728_v58, %s2953_s21  ;;  %v2628_v59 = vpop.f32.mrb[13].mxu1  ;;  %v1968_v58 = vld [vmem:[%s3149_s30 + $0x70] sm:$0xff] }
 0x8dd   : > { %v1969_v59 = vld [vmem:[%s3149_s30 + $0x78] sm:$0xff] }
 0x946   : > { %v1382_v60 = vpop.permute.xlu1 %1381 }
 0x947   : > { %1385 = vst.msk [vmem:[#allocation3] sm:$0xf] %vm1384_vm12, %v1382_v60  ;;  %v2800_v60 = vpack.c.bf16 %v1969_v59, %v1968_v58 }
 0x94a   : > { %v1558_v61 = vpop.permute.xlu1 %1557 }
 0x94b   : > { %1561 = vst.msk [vmem:[#allocation3] sm:$0xf] %vm1560_vm13, %v1558_v61  ;;  %v2525_v61 = vld [vmem:[%s768_s8] ss:$0 sm:$0xff]  ;;  %s3623_s8 = sld [smem:[#allocation5_spill]] }
 0x94e   : > { %v1734_v62 = vpop.permute.xlu0 %1733 }
 0x94f   : > { %1737 = vst.msk [vmem:[#allocation3] sm:$0xf] %vm1736_vm14, %v1734_v62 }
 0x951   : > { %p2528_p8 = scmp.ne.s32.totalorder %s3623_s8, 3 }
 0x952   : > { %s3624_s25 = sld [smem:[#allocation20_spill]] (!%p2528_p8)  ;;  %s3625_s6 = sld [smem:[#allocation21_spill]] (!%p2528_p8)  ;;  %vm2292_vm15 = vcmp.lt.s32.totalorder (!%p2528_p8), %v946_v22, 512 }
 0x956   : > { %v1738_v63 = vld [vmem:[#allocation3] sm:$0xf] }
 0x957   : > { %2646 = vmatmul.mubr.msk.f32.vlgmr.msra.gmra.mrb[4].mxu0 %vm956_vm3, %v1738_v63 }
 0x958   : > { %2699 = vmatprep.mubr.msk.f32.mxu0 %vm2952_vm6, %v2951_v1  ;;  %2780 = vmatpush3.bf16.msra.mxu0 %v2779_v28  ;;  %v2063_v14 = vld [vmem:[%s3624_s25 + $0x8] sm:$0xff] (!%p2528_p8)  ;;  %v2065_v16 = vld [vmem:[%s3624_s25 + $0x18] sm:$0xff] (!%p2528_p8)  ;;  %v2062_v19 = vld [vmem:[%s3624_s25] sm:$0xff] (!%p2528_p8) }
 0x959   : > { %2781 = vmatprep.subr.bf16.mxu0 %v2960_v42  ;;  %v2066_v20 = vld [vmem:[%s3624_s25 + $0x20] sm:$0xff] (!%p2528_p8)  ;;  %v2072_v41 = vld [vmem:[%s3624_s25 + $0x50] sm:$0xff] (!%p2528_p8)  ;;  %v2079_v46 = vld [vmem:[%s3624_s25 + $0x88] sm:$0xff] (!%p2528_p8) }
 0x95a   : > { %v2804_v28 = vpack.c.bf16 (!%p2528_p8), %v2066_v20, %v2062_v19  ;;  %v2070_v39 = vld [vmem:[%s3624_s25 + $0x40] sm:$0xff] (!%p2528_p8)  ;;  %v2083_v47 = vld [vmem:[%s3624_s25 + $0xa8] sm:$0xff] (!%p2528_p8)  ;;  %v2085_v52 = vld [vmem:[%s3624_s25 + $0xb8] sm:$0xff] (!%p2528_p8) }
 0x95b   : > { %v2810_v50 = vpack.c.bf16 (!%p2528_p8), %v2083_v47, %v2079_v46  ;;  %v2078_v53 = vld [vmem:[%s3624_s25 + $0x80] sm:$0xff] (!%p2528_p8)  ;;  %v2080_v56 = vld [vmem:[%s3624_s25 + $0x90] sm:$0xff] (!%p2528_p8) }
 0x95c   : > { %2783 = vmatpush3.bf16.msra.mxu0 %v2782_v40  ;;  %v2074_v40 = vld [vmem:[%s3624_s25 + $0x60] sm:$0xff] (!%p2528_p8) }
 0x95d   : > { %2784 = vmatprep.subr.bf16.mxu0 %v2960_v42  ;;  %v2808_v43 = vpack.c.bf16 (!%p2528_p8), %v2074_v40, %v2070_v39  ;;  %v2082_v55 = vld [vmem:[%s3624_s25 + $0xa0] sm:$0xff] (!%p2528_p8) }
 0x95e   : > { %v2812_v59 = vpack.c.bf16 (!%p2528_p8), %v2082_v55, %v2078_v53 }
 0x960   : > { %2786 = vmatpush3.bf16.msra.mxu0 %v2785_v44  ;;  %v2076_v44 = vld [vmem:[%s3624_s25 + $0x70] sm:$0xff] (!%p2528_p8) }
 0x961   : > { %2787 = vmatprep.subr.bf16.mxu0 %v2960_v42  ;;  %v2824_v49 = vpack.c.bf16 (!%p2528_p8), %v2076_v44, %v2072_v41 }
 0x964   : > { %2789 = vmatpush3.bf16.msra.mxu0 %v2788_v48 }
 0x965   : > { %2790 = vmatprep.subr.bf16.mxu0 %v2960_v42 }
 0x968   : > { %2792 = vmatpush3.bf16.msra.mxu0 %v2791_v51  ;;  %v2081_v51 = vld [vmem:[%s3624_s25 + $0x98] sm:$0xff] (!%p2528_p8) }
 0x969   : > { %2793 = vmatprep.subr.bf16.mxu0 %v2960_v42 }
 0x96c   : > { %2795 = vmatpush3.bf16.msra.mxu0 %v2794_v54  ;;  %v2826_v54 = vpack.c.bf16 (!%p2528_p8), %v2085_v52, %v2081_v51 }
 0x96d   : > { %2796 = vmatprep.subr.bf16.mxu0 %v2960_v42 }
 0x970   : > { %2798 = vmatpush3.bf16.msra.mxu0 %v2797_v57  ;;  %v2084_v57 = vld [vmem:[%s3624_s25 + $0xb0] sm:$0xff] (!%p2528_p8) }
 0x971   : > { %2799 = vmatprep.subr.bf16.mxu0 %v2960_v42 }
 0x974   : > { %2801 = vmatpush3.bf16.msra.mxu0 %v2800_v60  ;;  %v2087_v60 = vld [vmem:[%s3624_s25 + $0xc8] sm:$0xff] (!%p2528_p8) }
 0xa2a   : > { %v1823_v2 = vpop.f32.mrb[4].mxu0 }
 0xa2b   : > { %v1824_v3 = vadd.f32 %v2521_v0, %v1823_v2  ;;  %v2647_v4 = vpop.f32.mrb[5].mxu0 }
 0xa2d   : > { %v3372_v5 = vadd.f32 %v1824_v3, %v3240_v45  ;;  %v2767_v45 = vpack.c.bf16 %v1858_v12, %v1857_v11 }
 0xa2f   : > { %v1830_v6 = vsel %vm899_vm2, %v3372_v5, 0.0  ;;  %2768 = vmatpush3.bf16.msra.mxu1 %v2767_v45 }
 0xa30   : > { %1831 = vadd.xlane.f32.xlu1 %v1830_v6  ;;  %2769 = vmatprep.subr.bf16.mxu1 %v2960_v42 }
 0xa33   : > { %2771 = vmatpush3.bf16.msra.mxu1 %v2770_v15  ;;  %v2067_v15 = vld [vmem:[%s3624_s25 + $0x28] sm:$0xff] (!%p2528_p8) }
 0xa34   : > { %2772 = vmatprep.subr.bf16.mxu1 %v2960_v42 }
 0xa37   : > { %2774 = vmatpush3.bf16.msra.mxu1 %v2773_v18  ;;  %v2069_v18 = vld [vmem:[%s3624_s25 + $0x38] sm:$0xff] (!%p2528_p8) }
 0xa38   : > { %2775 = vmatprep.subr.bf16.mxu1 %v2960_v42  ;;  %v2818_v27 = vpack.c.bf16 (!%p2528_p8), %v2069_v18, %v2065_v16 }
 0xa3b   : > { %2777 = vmatpush3.bf16.msra.mxu1 %v2776_v21  ;;  %v2961_v21 = vmov (!%p2528_p8), 0.0  }
 0xa3c   : > { %2819 = vmatprep.subr.bf16.mxu1 (!%p2528_p8), %v2818_v27 }
 0xabd   : > { %v1832_v7 = vpop.xlane.xlu1 %1831 }
 0xabe   : > { %v1833_v1 = vmul.f32 0.015625, %v1832_v7 }
 0xac0   : > { %v1834_v8 = vsub.f32 %v3372_v5, %v1833_v1 }
 0xac2   : > { %v1835_v9 = vmul.f32 %v1834_v8, %v1834_v8 }
 0xac4   : > { %v1836_v10 = vsel %vm899_vm2, %v1835_v9, 0.0 }
 0xac5   : > { %1837 = vadd.xlane.f32.xlu0 %v1836_v10  ;;  %v2527_v10 = vld [vmem:[%s776_s16] ss:$0 sm:$0xff] }
 0xb52   : > { %v1838_v29 = vpop.xlane.xlu0 %1837 }
 0xb53   : > { %v1839_v30 = vmul.f32 0.015625, %v1838_v29  ;;  %v2064_v29 = vld [vmem:[%s3624_s25 + $0x10] sm:$0xff] (!%p2528_p8) }
 0xb55   : > { %v1840_v31 = vadd.f32 1e-05, %v1839_v30  ;;  %v2068_v30 = vld [vmem:[%s3624_s25 + $0x30] sm:$0xff] (!%p2528_p8) }
 0xb57   : > { %2906 = vrsqrt.f32 %v1840_v31  ;;  %v2071_v31 = vld [vmem:[%s3624_s25 + $0x48] sm:$0xff] (!%p2528_p8) }
 0xb61   : > { %v2907_v32 = vpop.eup %2906 }
 0xb62   : > { %v1842_v34 = vmul.f32 %v2907_v32, %v1834_v8  ;;  %v2820_v32 = vpack.c.bf16 (!%p2528_p8), %v2068_v30, %v2064_v29 }
 0xb64   : > { %v1849_v36 = vmul.f32 %v2523_v33, %v1842_v34  ;;  %v2075_v33 = vld [vmem:[%s3624_s25 + $0x68] sm:$0xff] (!%p2528_p8)  ;;  %v2073_v34 = vld [vmem:[%s3624_s25 + $0x58] sm:$0xff] (!%p2528_p8) }
 0xb66   : > { %v1856_v37 = vadd.f32 %v2524_v35, %v1849_v36  ;;  %v2077_v35 = vld [vmem:[%s3624_s25 + $0x78] sm:$0xff] (!%p2528_p8) }
 0xb67   : > { %v2822_v38 = vpack.c.bf16 (!%p2528_p8), %v2077_v35, %v2073_v34 }
 0xb68   : > { %2665 = vmatmul.mubr.msk.f32.vlgmr.msra.gmra.mrb[14].mxu1 %vm956_vm3, %v1856_v37  ;;  %v2806_v37 = vpack.c.bf16 (!%p2528_p8), %v2075_v33, %v2071_v31 }
 0xb69   : > { %2254 = vmatprep.mubr.f32.mxu1 (!%p2528_p8), %v2961_v21  ;;  %2821 = vmatpush1.bf16.msra.mxu1 (!%p2528_p8), %v2820_v32 }
 0xb6a   : > { %2823 = vmatprep.subr.bf16.mxu1 (!%p2528_p8), %v2822_v38 }
 0xb6d   : > { %2825 = vmatpush1.bf16.msra.mxu1 (!%p2528_p8), %v2824_v49 }
 0xb6e   : > { %2827 = vmatprep.subr.bf16.mxu1 (!%p2528_p8), %v2826_v54 }
 0xc3b   : > { %v1941_v62 = vpop.f32.mrb[14].mxu1 }
 0xc3c   : > { %v1942_v63 = vadd.f32 %v2525_v61, %v1941_v62  ;;  %v2666_v0 = vpop.f32.mrb[15].mxu1  ;;  %v2091_v61 = vld [vmem:[%s3624_s25 + $0xe8] sm:$0xff] (!%p2528_p8)  ;;  %v2089_v62 = vld [vmem:[%s3624_s25 + $0xd8] sm:$0xff] (!%p2528_p8) }
 0xc3d   : > { %v2814_v0 = vpack.c.bf16 (!%p2528_p8), %v2091_v61, %v2087_v60 }
 0xc3e   : > { %v1945_v2 = vmul.f32 %v1942_v63, %v1942_v63 }
 0xc40   : > { %v1946_v3 = vmul.f32 %v1945_v2, %v1942_v63  ;;  %v2093_v2 = vld [vmem:[%s3624_s25 + $0xf8] sm:$0xff] (!%p2528_p8) }
 0xc42   : > { %v1947_v4 = vmul.f32 0.044715, %v1946_v3  ;;  %v2086_v3 = vld [vmem:[%s3624_s25 + $0xc0] sm:$0xff] (!%p2528_p8) }
 0xc44   : > { %v1948_v6 = vadd.f32 %v1947_v4, %v1942_v63  ;;  %v2090_v4 = vld [vmem:[%s3624_s25 + $0xe0] sm:$0xff] (!%p2528_p8) }
 0xc46   : > { %v1949_v7 = vmul.f32 0.7978846, %v1948_v6 }
 0xc48   : > { %2908 = vtanh.f32 %v1949_v7  ;;  %v2830_v7 = vpack.c.bf16 (!%p2528_p8), %v2093_v2, %v2089_v62 }
 0xc52   : > { %v2909_v1 = vpop.eup %2908 }
 0xc53   : > { %v1951_v8 = vadd.f32 1.0, %v2909_v1  ;;  %v2088_v1 = vld [vmem:[%s3624_s25 + $0xd0] sm:$0xff] (!%p2528_p8) }
 0xc55   : > { %v1952_v9 = vmul.f32 0.5, %v1951_v8  ;;  %v2092_v8 = vld [vmem:[%s3624_s25 + $0xf0] sm:$0xff] (!%p2528_p8) }
 0xc57   : > { %v1953_v42 = vmul.f32 %v1952_v9, %v1942_v63  ;;  %v2828_v63 = vpack.c.bf16 (!%p2528_p8), %v2084_v57, %v2080_v56 }
 0xc59   : > { %2700 = vmatmul.mubr.f32.vlgmr.msra.gmra.mrb[6].mxu0 %v1953_v42  ;;  %v2816_v42 = vpack.c.bf16 (!%p2528_p8), %v2090_v4, %v2086_v3  ;;  %2829 = vmatpush1.bf16.msra.mxu1 (!%p2528_p8), %v2828_v63 }
 0xc5a   : > { %2183 = vmatprep.mubr.f32.mxu0 (!%p2528_p8), %v2961_v21  ;;  %2831 = vmatprep.subr.bf16.mxu1 (!%p2528_p8), %v2830_v7 }
 0xd2b   : > { %2052 = sbr.rel (%p2528_p8) target bundleno = 3617 (0xe21), region = 100 }
 0xd2c   : > { %v2043_v11 = vpop.f32.mrb[6].mxu0 }
 0xd2d   : > { %v2044_v12 = vadd.f32 %v2527_v10, %v2043_v11  ;;  %v2701_v45 = vpop.f32.mrb[7].mxu0  ;;  %v2832_v10 = vpack.c.bf16 (!%p2528_p8), %v2092_v8, %v2088_v1 }
 0xd2e   : > { %v2106_v45 = vsub.s32 (!%p2528_p8), 2, %v3277_v23 }
 0xd2f   : > { %v2047_v13 = vadd.f32 %v2044_v12, %v3372_v5  ;;  %v2802_v5 = vpack.c.bf16 (!%p2528_p8), %v2067_v15, %v2063_v14  ;;  %2833 = vmatpush1.bf16.msra.mxu1 (!%p2528_p8), %v2832_v10  ;;  %v2094_v12 = vld [vmem:[%s3625_s6] sm:$0xf] (!%p2528_p8)  ;;  %v2110_v15 = vsub.s32 (!%p2528_p8), 3, %v3277_v23 }
 0xd30   : > { %v2099_v16 = vrot.slane (!%p2528_p8), %v2094_v12, %v948_v24 }
 0xd31   : > { %2048 = vst.msk [vmem:[#allocation2] sm:$0xf] %vm899_vm2, %v2047_v13  ;;  %v2053_v17 = vsel (!%p2528_p8), %vm899_vm2, %v2047_v13, 0.0  ;;  %2803 = vmatprep.subr.bf16.mxu0 (!%p2528_p8), %v2802_v5  ;;  %v2962_v13 = vmov (!%p2528_p8), 1966171168   ;;  %v2103_v5 = vrot.slane (!%p2528_p8), %v2094_v12, %v952_v26  ;;  %v2111_v19 = vrot.slane (!%p2528_p8), %v2094_v12, %v2110_v15 }
 0xd32   : > { %v2054_v25 = vrot.slane %v2053_v17, 4  ;;  %2805 = vmatpush1.bf16.msra.mxu0 %v2804_v28  ;;  %v2268_v14 = vunpack.c.l.s4 %v2962_v13 }
 0xd33   : > { %2807 = vmatprep.subr.bf16.mxu0 %v2806_v37 }
 0xd34   : > { %v2055_v36 = vadd.f32 %v2054_v25, %v2053_v17  ;;  %v2107_v17 = vrot.slane %v2094_v12, %v2106_v45  ;;  %v2269_v18 = vunpack.c.0.s8 %v2268_v14 }
 0xd36   : > { %v2056_v48 = vrot.slane %v2055_v36, 2  ;;  %2809 = vmatpush1.bf16.msra.mxu0 %v2808_v43  ;;  %v2272_v30 = vsub.s32 %v2269_v18, %v3277_v23 }
 0xd37   : > { %2811 = vmatprep.subr.bf16.mxu0 %v2810_v50 }
 0xd38   : > { %v2057_v58 = vadd.f32 %v2056_v48, %v2055_v36 }
 0xd3a   : > { %v2058_v6 = vrot.slane %v2057_v58, 1  ;;  %2813 = vmatpush1.bf16.msra.mxu0 %v2812_v59 }
 0xd3b   : > { %2815 = vmatprep.subr.bf16.mxu0 %v2814_v0 }
 0xd3c   : > { %v2059_v9 = vadd.f32 %v2058_v6, %v2057_v58 }
 0xd3e   : > { %v2061_v11 = vmul.f32 0.25, %v2059_v9  ;;  %2817 = vmatpush1.bf16.msra.mxu0 %v2816_v42 }
 0xd40   : > { %2530 = vmatmul.mubr.msk.f32.vlgmr.msra.gmra.mrb[0].mxu1 %vm956_vm3, %v2061_v11 }
 0xd41   : > { %2529 = vmatmul.mubr.msk.f32.vlgmr.msra.gmra.mrb[0].mxu0 %vm956_vm3, %v2061_v11 }
 0xe13   : > { %v2256_v25 = vpop.f32.mrb[0].mxu1 }
 0xe14   : > { %v2185_v20 = vpop.f32.mrb[0].mxu0  ;;  %v2257_v28 = vadd.f32 %v2256_v25, %v2107_v17  ;;  %v2258_v31 = vpop.f32.mrb[1].mxu1 }
 0xe15   : > { %v2186_v21 = vadd.f32 %v2185_v20, %v2099_v16  ;;  %v2187_v27 = vpop.f32.mrb[1].mxu0  ;;  %v2259_v32 = vadd.f32 %v2258_v31, %v2111_v19 }
 0xe16   : > { %v2188_v29 = vadd.f32 %v2187_v27, %v2103_v5 }
 0xe17   : > { %v2266_v34 = vcombine.low %v2257_v28, %v2259_v32 }
 0xe18   : > { %v2265_v33 = vcombine.low %v2186_v21, %v2188_v29 }
 0xe19   : > { %v2280_v35 = vrot.slane %v2266_v34, %v2272_v30 }
 0xe1a   : > { %v2273_v24 = vrot.slane %v2265_v33, %v2272_v30 }
 0xe1c   : > { %v2281_v36 = vcombine.low %v2273_v24, %v2280_v35 }
 0xe1e   : > { %v2288_v26 = vrot.slane %v2281_v36, %v2272_v30 }
 0xe20   : > { %2294 = vst.msk [vmem:[%s3158_s0] sm:$0xf] %vm2292_vm15, %v2288_v26 }
 0xe21 PF: > { %s3626_s23 = sld [smem:[#allocation8_spill]]  ;;  %s3627_s27 = sld [smem:[#allocation6_spill]] }
 0xe22   : > { %s3628_s28 = sld [smem:[#allocation7_spill]]  ;;  %s3629_s29 = sld [smem:[#allocation9_spill]] }
 0xe23   : > { %s3630_s30 = sld [smem:[#allocation10_spill]] }
 0xe27   : > { %s28_s0 = sadd.s32 1, %s3626_s23  }
 0xe28   : > { %p25_p9 = scmp.ge.s32.totalorder %s28_s0, 10  }
 0xe2a   :  { %27 = sbr.rel (!%p25_p9) target bundleno = 12 (0xc), region = 166 }

// kernel: abstraction_pipeline_forward.5
= control target key start
LH: loop header
LB: loop body
LE: loop exit
PB: predicated region body
PF: predicated region fallthrough
CT: control target
= control target key end

     0   :  { %s902_s12 = smov 0   ;;  %s1196_s0 = inlined_call_operand.vmem [shape: f32[512,144], index: 0, kind: input, shape index: {}]   ;;  %s1197_s1 = inlined_call_operand.vmem [shape: f32[144,3], index: 1, kind: input, shape index: {}]   ;;  %s1198_s2 = inlined_call_operand.vmem [shape: f32[1,3], index: 2, kind: input, shape index: {}]   ;;  %s1199_s3 = inlined_call_operand.vmem [shape: f32[512,3], index: 3, kind: output, shape index: {}]  }
   0x1 LB: > { %s709_s13 = sadd.s32 4294967295, %s879_s12   ;;  %p713_p0 = scmp.ge.s32.totalorder %s879_s12, 1  ;;  %s879_s12 = sphi %s902_s12, %s13_s12  }
   0x2   : > { %p139_p1 = scmp.lt.s32.totalorder %s879_s12, 3 }
   0x4   : > { %p140_p2 = pnand %p713_p0, %p139_p1 }
   0x5   : > { %v241_v0 = vld [vmem:[%s1197_s1] sm:$0xff] (!%p140_p2)  ;;  %v242_v1 = vld [vmem:[%s1197_s1 + $0x8] sm:$0xff] (!%p140_p2)  ;;  %v243_v2 = vld [vmem:[%s1197_s1 + $0x10] sm:$0xff] (!%p140_p2)  ;;  %s714_s20 = sshll.u32 (!%p140_p2), %s709_s13, 5  ;;  %v881_v3 = vmov (!%p140_p2), 0.0|0.0   ;;  %vm266_vm0 = vcmask (!%p140_p2), 130048  }
   0x6   : > { %143 = sbr.rel (%p140_p2) target bundleno = 330 (0x14a), region = 32  ;;  %755 = vmatprep.subr.bf16.mxu0 (!%p140_p2), %v881_v3  ;;  %782 = vmatprep.subr.bf16.mxu1 (!%p140_p2), %v881_v3  ;;  %v756_v4 = vpack.c.bf16 (!%p140_p2), %v242_v1, %v241_v0  ;;  %v244_v5 = vld [vmem:[%s1197_s1 + $0x18] sm:$0xff] (!%p140_p2)  ;;  %p165_p3 = scmp.lt.s32.totalorder (!%p140_p2), %s714_s20, 63  ;;  %v245_v7 = vld [vmem:[%s1197_s1 + $0x20] sm:$0xff] (!%p140_p2)  ;;  %v246_v8 = vld [vmem:[%s1197_s1 + $0x28] sm:$0xff] (!%p140_p2)  ;;  %vm620_vm1 = vcmask (!%p140_p2), 23552  }
   0x7   : > { %v759_v6 = vpack.c.bf16 (!%p140_p2), %v244_v5, %v243_v2  ;;  %v762_v9 = vpack.c.bf16 (!%p140_p2), %v246_v8, %v245_v7  ;;  %v247_v12 = vld [vmem:[%s1197_s1 + $0x30] sm:$0xff] (!%p140_p2)  ;;  %v248_v13 = vld [vmem:[%s1197_s1 + $0x38] sm:$0xff] (!%p140_p2)  ;;  %v249_v15 = vld [vmem:[%s1197_s1 + $0x40] sm:$0xff] (!%p140_p2) }
   0x8   : > { %757 = vmatpush1.bf16.msra.mxu0 (!%p140_p2), %v756_v4  ;;  %791 = vmatpush1.bf16.msra.mxu1 (!%p140_p2), %v756_v4  ;;  %v765_v14 = vpack.c.bf16 (!%p140_p2), %v248_v13, %v247_v12  ;;  %v250_v16 = vld [vmem:[%s1197_s1 + $0x48] sm:$0xff] (!%p140_p2)  ;;  %v251_v18 = vld [vmem:[%s1197_s1 + $0x50] sm:$0xff] (!%p140_p2)  ;;  %v252_v19 = vld [vmem:[%s1197_s1 + $0x58] sm:$0xff] (!%p140_p2) }
   0x9   : > { %758 = vmatprep.subr.bf16.mxu0 (!%p140_p2), %v881_v3  ;;  %783 = vmatprep.subr.bf16.mxu1 (!%p140_p2), %v881_v3  ;;  %v768_v17 = vpack.c.bf16 (!%p140_p2), %v250_v16, %v249_v15  ;;  %v771_v20 = vpack.c.bf16 (!%p140_p2), %v252_v19, %v251_v18  ;;  %v253_v21 = vld [vmem:[%s1197_s1 + $0x60] sm:$0xff] (!%p140_p2)  ;;  %v254_v22 = vld [vmem:[%s1197_s1 + $0x68] sm:$0xff] (!%p140_p2)  ;;  %v255_v24 = vld [vmem:[%s1197_s1 + $0x70] sm:$0xff] (!%p140_p2) }
   0xa   : > { %v774_v23 = vpack.c.bf16 (!%p140_p2), %v254_v22, %v253_v21  ;;  %v256_v25 = vld [vmem:[%s1197_s1 + $0x78] sm:$0xff] (!%p140_p2)  ;;  %v257_v27 = vld [vmem:[%s1197_s1 + $0x80] sm:$0xff] (!%p140_p2)  ;;  %v258_v28 = vld [vmem:[%s1197_s1 + $0x88] sm:$0xff] (!%p140_p2) }
   0xb   : > { %v777_v26 = vpack.c.bf16 (!%p140_p2), %v256_v25, %v255_v24  ;;  %v780_v29 = vpack.c.bf16 (!%p140_p2), %v258_v28, %v257_v27  ;;  %v1089_v28 = vld [vmem:[%s1198_s2] ss:$0 sm:$0xff] (!%p140_p2) }
   0xc   : > { %760 = vmatpush1.bf16.msra.mxu0 (!%p140_p2), %v759_v6  ;;  %792 = vmatpush1.bf16.msra.mxu1 (!%p140_p2), %v759_v6 }
   0xd   : > { %s1201_s20 = smov (!%p165_p3, %s714_s20), 63  ;;  %761 = vmatprep.subr.bf16.mxu0 %v881_v3  ;;  %784 = vmatprep.subr.bf16.mxu1 %v881_v3 }
   0xe   : > { %s754_s27 = sshll.u32 %s1201_s20, 4 }
   0xf   : > { %s938_s30 = scalar_lea.vmem %s1196_s0, %s754_s27 }
  0x10   : > { %v178_v10 = vld [vmem:[%s938_s30 + $0x8] sm:$0xff]  ;;  %763 = vmatpush1.bf16.msra.mxu0 %v762_v9  ;;  %793 = vmatpush1.bf16.msra.mxu1 %v762_v9  ;;  %v177_v30 = vld [vmem:[%s938_s30] sm:$0xff]  ;;  %v180_v32 = vld [vmem:[%s938_s30 + $0x18] sm:$0xff] }
  0x11   : > { %v210_v11 = vld [vmem:[%s938_s30 + $0x108] sm:$0xff]  ;;  %720 = vmatprep.mubr.msk.f32.mxu0 %vm266_vm0, %v178_v10  ;;  %764 = vmatprep.subr.bf16.mxu0 %v881_v3  ;;  %v209_v31 = vld [vmem:[%s938_s30 + $0x100] sm:$0xff]  ;;  %v212_v33 = vld [vmem:[%s938_s30 + $0x118] sm:$0xff] }
  0x12   : > { %736 = vmatprep.mubr.msk.f32.mxu1 %vm266_vm0, %v210_v11  ;;  %785 = vmatprep.subr.bf16.mxu1 %v881_v3  ;;  %v179_v34 = vld [vmem:[%s938_s30 + $0x10] sm:$0xff]  ;;  %v182_v36 = vld [vmem:[%s938_s30 + $0x28] sm:$0xff]  ;;  %v181_v38 = vld [vmem:[%s938_s30 + $0x20] sm:$0xff] }
  0x13   : > { %v211_v35 = vld [vmem:[%s938_s30 + $0x110] sm:$0xff]  ;;  %v214_v37 = vld [vmem:[%s938_s30 + $0x128] sm:$0xff]  ;;  %v213_v39 = vld [vmem:[%s938_s30 + $0x120] sm:$0xff] }
  0x14   : > { %766 = vmatpush1.bf16.msra.mxu0 %v765_v14  ;;  %794 = vmatpush1.bf16.msra.mxu1 %v765_v14  ;;  %v184_v40 = vld [vmem:[%s938_s30 + $0x38] sm:$0xff]  ;;  %v183_v42 = vld [vmem:[%s938_s30 + $0x30] sm:$0xff]  ;;  %v186_v44 = vld [vmem:[%s938_s30 + $0x48] sm:$0xff] }
  0x15   : > { %767 = vmatprep.subr.bf16.mxu0 %v881_v3  ;;  %786 = vmatprep.subr.bf16.mxu1 %v881_v3  ;;  %v216_v41 = vld [vmem:[%s938_s30 + $0x138] sm:$0xff]  ;;  %v215_v43 = vld [vmem:[%s938_s30 + $0x130] sm:$0xff]  ;;  %v218_v45 = vld [vmem:[%s938_s30 + $0x148] sm:$0xff] }
  0x16   : > { %v185_v46 = vld [vmem:[%s938_s30 + $0x40] sm:$0xff]  ;;  %v188_v48 = vld [vmem:[%s938_s30 + $0x58] sm:$0xff]  ;;  %v187_v50 = vld [vmem:[%s938_s30 + $0x50] sm:$0xff] }
  0x17   : > { %v217_v47 = vld [vmem:[%s938_s30 + $0x140] sm:$0xff]  ;;  %v220_v49 = vld [vmem:[%s938_s30 + $0x158] sm:$0xff]  ;;  %v219_v51 = vld [vmem:[%s938_s30 + $0x150] sm:$0xff] }
  0x18   : > { %769 = vmatpush1.bf16.msra.mxu0 %v768_v17  ;;  %795 = vmatpush1.bf16.msra.mxu1 %v768_v17  ;;  %v190_v52 = vld [vmem:[%s938_s30 + $0x68] sm:$0xff]  ;;  %v189_v54 = vld [vmem:[%s938_s30 + $0x60] sm:$0xff]  ;;  %v192_v56 = vld [vmem:[%s938_s30 + $0x78] sm:$0xff] }
  0x19   : > { %770 = vmatprep.subr.bf16.mxu0 %v881_v3  ;;  %787 = vmatprep.subr.bf16.mxu1 %v881_v3  ;;  %v222_v53 = vld [vmem:[%s938_s30 + $0x168] sm:$0xff]  ;;  %v221_v55 = vld [vmem:[%s938_s30 + $0x160] sm:$0xff]  ;;  %v224_v57 = vld [vmem:[%s938_s30 + $0x178] sm:$0xff] }
  0x1a   : > { %v191_v58 = vld [vmem:[%s938_s30 + $0x70] sm:$0xff]  ;;  %v194_v60 = vld [vmem:[%s938_s30 + $0x88] sm:$0xff]  ;;  %v193_v62 = vld [vmem:[%s938_s30 + $0x80] sm:$0xff] }
  0x1b   : > { %v223_v59 = vld [vmem:[%s938_s30 + $0x170] sm:$0xff]  ;;  %v226_v61 = vld [vmem:[%s938_s30 + $0x188] sm:$0xff]  ;;  %v225_v63 = vld [vmem:[%s938_s30 + $0x180] sm:$0xff] }
  0x1c   : > { %772 = vmatpush1.bf16.msra.mxu0 %v771_v20  ;;  %796 = vmatpush1.bf16.msra.mxu1 %v771_v20  ;;  %v196_v0 = vld [vmem:[%s938_s30 + $0x98] sm:$0xff]  ;;  %v195_v2 = vld [vmem:[%s938_s30 + $0x90] sm:$0xff]  ;;  %v198_v4 = vld [vmem:[%s938_s30 + $0xa8] sm:$0xff] }
  0x1d   : > { %773 = vmatprep.subr.bf16.mxu0 %v881_v3  ;;  %788 = vmatprep.subr.bf16.mxu1 %v881_v3  ;;  %v228_v1 = vld [vmem:[%s938_s30 + $0x198] sm:$0xff]  ;;  %v230_v5 = vld [vmem:[%s938_s30 + $0x1a8] sm:$0xff]  ;;  %v197_v6 = vld [vmem:[%s938_s30 + $0xa0] sm:$0xff] }
  0x1e   : > { %v229_v7 = vld [vmem:[%s938_s30 + $0x1a0] sm:$0xff]  ;;  %v200_v8 = vld [vmem:[%s938_s30 + $0xb8] sm:$0xff]  ;;  %v199_v10 = vld [vmem:[%s938_s30 + $0xb0] sm:$0xff] }
  0x1f   : > { %v232_v9 = vld [vmem:[%s938_s30 + $0x1b8] sm:$0xff]  ;;  %v231_v11 = vld [vmem:[%s938_s30 + $0x1b0] sm:$0xff]  ;;  %v202_v12 = vld [vmem:[%s938_s30 + $0xc8] sm:$0xff] }
  0x20   : > { %775 = vmatpush1.bf16.msra.mxu0 %v774_v23  ;;  %797 = vmatpush1.bf16.msra.mxu1 %v774_v23  ;;  %v234_v13 = vld [vmem:[%s938_s30 + $0x1c8] sm:$0xff]  ;;  %v201_v14 = vld [vmem:[%s938_s30 + $0xc0] sm:$0xff]  ;;  %v204_v16 = vld [vmem:[%s938_s30 + $0xd8] sm:$0xff] }
  0x21   : > { %776 = vmatprep.subr.bf16.mxu0 %v881_v3  ;;  %789 = vmatprep.subr.bf16.mxu1 %v881_v3  ;;  %v233_v15 = vld [vmem:[%s938_s30 + $0x1c0] sm:$0xff]  ;;  %v236_v17 = vld [vmem:[%s938_s30 + $0x1d8] sm:$0xff]  ;;  %v203_v18 = vld [vmem:[%s938_s30 + $0xd0] sm:$0xff] }
  0x22   : > { %v235_v19 = vld [vmem:[%s938_s30 + $0x1d0] sm:$0xff]  ;;  %v206_v20 = vld [vmem:[%s938_s30 + $0xe8] sm:$0xff]  ;;  %v205_v22 = vld [vmem:[%s938_s30 + $0xe0] sm:$0xff] }
  0x23   : > { %v238_v21 = vld [vmem:[%s938_s30 + $0x1e8] sm:$0xff]  ;;  %v237_v23 = vld [vmem:[%s938_s30 + $0x1e0] sm:$0xff]  ;;  %v208_v24 = vld [vmem:[%s938_s30 + $0xf8] sm:$0xff] }
  0x24   : > { %778 = vmatpush1.bf16.msra.mxu0 %v777_v26  ;;  %798 = vmatpush1.bf16.msra.mxu1 %v777_v26  ;;  %v240_v25 = vld [vmem:[%s938_s30 + $0x1f8] sm:$0xff]  ;;  %v207_v26 = vld [vmem:[%s938_s30 + $0xf0] sm:$0xff] }
  0x25   : > { %779 = vmatprep.subr.bf16.mxu0 %v881_v3  ;;  %790 = vmatprep.subr.bf16.mxu1 %v881_v3  ;;  %v227_v3 = vld [vmem:[%s938_s30 + $0x190] sm:$0xff] }
  0x26   : > { %v239_v27 = vld [vmem:[%s938_s30 + $0x1f0] sm:$0xff]  ;;  %s718_s30 = sshll.u32 %s1201_s20, 3 }
  0x27   : > { %s1101_s8 = scalar_lea.vmem %s1199_s3, %s718_s30 }
  0x28   : > { %781 = vmatpush1.bf16.msra.mxu0 %v780_v29  ;;  %799 = vmatpush1.bf16.msra.mxu1 %v780_v29 }
  0x2b   : > { %428 = vmatmul.mubr.f32.vlgmr.msra.gmra.mrb[0].mxu0 %v177_v30  ;;  %508 = vmatmul.mubr.f32.vlgmr.msra.gmra.mrb[0].mxu1 %v209_v31 }
  0x2c   : > { %721 = vmatprep.mubr.msk.f32.mxu0 %vm266_vm0, %v180_v32  ;;  %737 = vmatprep.mubr.msk.f32.mxu1 %vm266_vm0, %v212_v33 }
  0x2f   : > { %433 = vmatmul.mubr.f32.gmra.mrb[2].mxu0 %v179_v34  ;;  %513 = vmatmul.mubr.f32.gmra.mrb[2].mxu1 %v211_v35 }
  0x30   : > { %722 = vmatprep.mubr.msk.f32.mxu0 %vm266_vm0, %v182_v36  ;;  %738 = vmatprep.mubr.msk.f32.mxu1 %vm266_vm0, %v214_v37 }
  0x33   : > { %438 = vmatmul.mubr.f32.gmra.mrb[4].mxu0 %v181_v38  ;;  %518 = vmatmul.mubr.f32.gmra.mrb[4].mxu1 %v213_v39 }
  0x34   : > { %723 = vmatprep.mubr.msk.f32.mxu0 %vm266_vm0, %v184_v40  ;;  %739 = vmatprep.mubr.msk.f32.mxu1 %vm266_vm0, %v216_v41 }
  0x37   : > { %443 = vmatmul.mubr.f32.gmra.mrb[6].mxu0 %v183_v42  ;;  %523 = vmatmul.mubr.f32.gmra.mrb[6].mxu1 %v215_v43 }
  0x38   : > { %724 = vmatprep.mubr.msk.f32.mxu0 %vm266_vm0, %v186_v44  ;;  %740 = vmatprep.mubr.msk.f32.mxu1 %vm266_vm0, %v218_v45 }
  0x3b   : > { %448 = vmatmul.mubr.f32.gmra.mrb[8].mxu0 %v185_v46  ;;  %528 = vmatmul.mubr.f32.gmra.mrb[8].mxu1 %v217_v47 }
  0x3c   : > { %725 = vmatprep.mubr.msk.f32.mxu0 %vm266_vm0, %v188_v48  ;;  %741 = vmatprep.mubr.msk.f32.mxu1 %vm266_vm0, %v220_v49 }
  0x3f   : > { %453 = vmatmul.mubr.f32.gmra.mrb[10].mxu0 %v187_v50  ;;  %533 = vmatmul.mubr.f32.gmra.mrb[10].mxu1 %v219_v51 }
  0x40   : > { %726 = vmatprep.mubr.msk.f32.mxu0 %vm266_vm0, %v190_v52  ;;  %742 = vmatprep.mubr.msk.f32.mxu1 %vm266_vm0, %v222_v53 }
  0x43   : > { %458 = vmatmul.mubr.f32.gmra.mrb[12].mxu0 %v189_v54  ;;  %538 = vmatmul.mubr.f32.gmra.mrb[12].mxu1 %v221_v55 }
  0x44   : > { %727 = vmatprep.mubr.msk.f32.mxu0 %vm266_vm0, %v192_v56  ;;  %743 = vmatprep.mubr.msk.f32.mxu1 %vm266_vm0, %v224_v57 }
  0x47   : > { %463 = vmatmul.mubr.f32.gmra.mrb[14].mxu0 %v191_v58  ;;  %543 = vmatmul.mubr.f32.gmra.mrb[14].mxu1 %v223_v59 }
  0x48   : > { %728 = vmatprep.mubr.msk.f32.mxu0 %vm266_vm0, %v194_v60  ;;  %744 = vmatprep.mubr.msk.f32.mxu1 %vm266_vm0, %v226_v61 }
  0x4b   : > { %468 = vmatmul.mubr.f32.gmra.mrb[16].mxu0 %v193_v62  ;;  %548 = vmatmul.mubr.f32.gmra.mrb[16].mxu1 %v225_v63 }
  0x4c   : > { %729 = vmatprep.mubr.msk.f32.mxu0 %vm266_vm0, %v196_v0  ;;  %745 = vmatprep.mubr.msk.f32.mxu1 %vm266_vm0, %v228_v1 }
  0x4f   : > { %473 = vmatmul.mubr.f32.gmra.mrb[18].mxu0 %v195_v2  ;;  %553 = vmatmul.mubr.f32.gmra.mrb[18].mxu1 %v227_v3 }
  0x50   : > { %730 = vmatprep.mubr.msk.f32.mxu0 %vm266_vm0, %v198_v4  ;;  %746 = vmatprep.mubr.msk.f32.mxu1 %vm266_vm0, %v230_v5 }
  0x53   : > { %478 = vmatmul.mubr.f32.gmra.mrb[20].mxu0 %v197_v6  ;;  %558 = vmatmul.mubr.f32.gmra.mrb[20].mxu1 %v229_v7 }
  0x54   : > { %731 = vmatprep.mubr.msk.f32.mxu0 %vm266_vm0, %v200_v8  ;;  %747 = vmatprep.mubr.msk.f32.mxu1 %vm266_vm0, %v232_v9 }
  0x57   : > { %483 = vmatmul.mubr.f32.gmra.mrb[22].mxu0 %v199_v10  ;;  %563 = vmatmul.mubr.f32.gmra.mrb[22].mxu1 %v231_v11 }
  0x58   : > { %732 = vmatprep.mubr.msk.f32.mxu0 %vm266_vm0, %v202_v12  ;;  %748 = vmatprep.mubr.msk.f32.mxu1 %vm266_vm0, %v234_v13 }
  0x5b   : > { %488 = vmatmul.mubr.f32.gmra.mrb[24].mxu0 %v201_v14  ;;  %568 = vmatmul.mubr.f32.gmra.mrb[24].mxu1 %v233_v15 }
  0x5c   : > { %733 = vmatprep.mubr.msk.f32.mxu0 %vm266_vm0, %v204_v16  ;;  %749 = vmatprep.mubr.msk.f32.mxu1 %vm266_vm0, %v236_v17 }
  0x5f   : > { %493 = vmatmul.mubr.f32.gmra.mrb[26].mxu0 %v203_v18  ;;  %573 = vmatmul.mubr.f32.gmra.mrb[26].mxu1 %v235_v19 }
  0x60   : > { %734 = vmatprep.mubr.msk.f32.mxu0 %vm266_vm0, %v206_v20  ;;  %750 = vmatprep.mubr.msk.f32.mxu1 %vm266_vm0, %v238_v21 }
  0x63   : > { %498 = vmatmul.mubr.f32.gmra.mrb[28].mxu0 %v205_v22  ;;  %578 = vmatmul.mubr.f32.gmra.mrb[28].mxu1 %v237_v23 }
  0x64   : > { %735 = vmatprep.mubr.msk.f32.mxu0 %vm266_vm0, %v208_v24  ;;  %751 = vmatprep.mubr.msk.f32.mxu1 %vm266_vm0, %v240_v25 }
  0x67   : > { %503 = vmatmul.mubr.f32.gmra.mrb[30].mxu0 %v207_v26  ;;  %583 = vmatmul.mubr.f32.gmra.mrb[30].mxu1 %v239_v27 }
  0xfe   : > { %v429_v29 = vpop.f32.mrb[0].mxu0  ;;  %v509_v30 = vpop.f32.mrb[0].mxu1 }
  0xff   : > { %v430_v31 = vadd.f32 %v1089_v28, %v429_v29  ;;  %v510_v32 = vadd.f32 %v1089_v28, %v509_v30  ;;  %v431_v33 = vpop.f32.mrb[1].mxu0  ;;  %v511_v34 = vpop.f32.mrb[1].mxu1 }
 0x101   : > { %809 = vtanh.f32 %v430_v31 }
 0x102   : > { %811 = vtanh.f32 %v510_v32  ;;  %v434_v35 = vpop.f32.mrb[2].mxu0  ;;  %v514_v36 = vpop.f32.mrb[2].mxu1 }
 0x103   : > { %v435_v37 = vadd.f32 %v1089_v28, %v434_v35  ;;  %v515_v38 = vadd.f32 %v1089_v28, %v514_v36  ;;  %v436_v39 = vpop.f32.mrb[3].mxu0  ;;  %v516_v40 = vpop.f32.mrb[3].mxu1 }
 0x105   : > { %813 = vtanh.f32 %v435_v37 }
 0x106   : > { %815 = vtanh.f32 %v515_v38  ;;  %v439_v41 = vpop.f32.mrb[4].mxu0  ;;  %v519_v42 = vpop.f32.mrb[4].mxu1 }
 0x107   : > { %v440_v43 = vadd.f32 %v1089_v28, %v439_v41  ;;  %v520_v44 = vadd.f32 %v1089_v28, %v519_v42  ;;  %v441_v45 = vpop.f32.mrb[5].mxu0  ;;  %v521_v46 = vpop.f32.mrb[5].mxu1 }
 0x109   : > { %817 = vtanh.f32 %v440_v43 }
 0x10a   : > { %819 = vtanh.f32 %v520_v44  ;;  %v444_v47 = vpop.f32.mrb[6].mxu0  ;;  %v524_v48 = vpop.f32.mrb[6].mxu1 }
 0x10b   : > { %v810_v49 = vpop.eup %809  ;;  %v445_v50 = vadd.f32 %v1089_v28, %v444_v47  ;;  %v525_v51 = vadd.f32 %v1089_v28, %v524_v48  ;;  %v446_v52 = vpop.f32.mrb[7].mxu0 }
 0x10c   : > { %v526_v53 = vpop.f32.mrb[7].mxu1  ;;  %v812_v54 = vpop.eup %811  ;;  %621 = vst.msk [vmem:[%s1101_s8] sm:$0xff] %vm620_vm1, %v810_v49 }
 0x10d   : > { %637 = vst.msk [vmem:[%s1101_s8 + $0x80] sm:$0xff] %vm620_vm1, %v812_v54  ;;  %821 = vtanh.f32 %v445_v50 }
 0x10e   : > { %823 = vtanh.f32 %v525_v51  ;;  %v449_v55 = vpop.f32.mrb[8].mxu0  ;;  %v529_v56 = vpop.f32.mrb[8].mxu1 }
 0x10f   : > { %v814_v57 = vpop.eup %813  ;;  %v450_v58 = vadd.f32 %v1089_v28, %v449_v55  ;;  %v530_v59 = vadd.f32 %v1089_v28, %v529_v56  ;;  %v451_v60 = vpop.f32.mrb[9].mxu0 }
 0x110   : > { %v531_v61 = vpop.f32.mrb[9].mxu1  ;;  %v816_v62 = vpop.eup %815  ;;  %622 = vst.msk [vmem:[%s1101_s8 + $0x8] sm:$0xff] %vm620_vm1, %v814_v57 }
 0x111   : > { %638 = vst.msk [vmem:[%s1101_s8 + $0x88] sm:$0xff] %vm620_vm1, %v816_v62  ;;  %825 = vtanh.f32 %v450_v58 }
 0x112   : > { %827 = vtanh.f32 %v530_v59  ;;  %v454_v63 = vpop.f32.mrb[10].mxu0  ;;  %v534_v0 = vpop.f32.mrb[10].mxu1 }
 0x113   : > { %v818_v1 = vpop.eup %817  ;;  %v455_v2 = vadd.f32 %v1089_v28, %v454_v63  ;;  %v535_v3 = vadd.f32 %v1089_v28, %v534_v0  ;;  %v456_v4 = vpop.f32.mrb[11].mxu0 }
 0x114   : > { %v536_v5 = vpop.f32.mrb[11].mxu1  ;;  %v820_v6 = vpop.eup %819  ;;  %623 = vst.msk [vmem:[%s1101_s8 + $0x10] sm:$0xff] %vm620_vm1, %v818_v1 }
 0x115   : > { %639 = vst.msk [vmem:[%s1101_s8 + $0x90] sm:$0xff] %vm620_vm1, %v820_v6  ;;  %829 = vtanh.f32 %v455_v2 }
 0x116   : > { %831 = vtanh.f32 %v535_v3  ;;  %v459_v7 = vpop.f32.mrb[12].mxu0  ;;  %v539_v8 = vpop.f32.mrb[12].mxu1 }
 0x117   : > { %v822_v9 = vpop.eup %821  ;;  %v460_v10 = vadd.f32 %v1089_v28, %v459_v7  ;;  %v540_v11 = vadd.f32 %v1089_v28, %v539_v8  ;;  %v461_v12 = vpop.f32.mrb[13].mxu0 }
 0x118   : > { %v541_v13 = vpop.f32.mrb[13].mxu1  ;;  %v824_v14 = vpop.eup %823  ;;  %624 = vst.msk [vmem:[%s1101_s8 + $0x18] sm:$0xff] %vm620_vm1, %v822_v9 }
 0x119   : > { %640 = vst.msk [vmem:[%s1101_s8 + $0x98] sm:$0xff] %vm620_vm1, %v824_v14  ;;  %833 = vtanh.f32 %v460_v10 }
 0x11a   : > { %835 = vtanh.f32 %v540_v11  ;;  %v464_v15 = vpop.f32.mrb[14].mxu0  ;;  %v544_v16 = vpop.f32.mrb[14].mxu1 }
 0x11b   : > { %v826_v17 = vpop.eup %825  ;;  %v465_v18 = vadd.f32 %v1089_v28, %v464_v15  ;;  %v545_v19 = vadd.f32 %v1089_v28, %v544_v16  ;;  %v466_v20 = vpop.f32.mrb[15].mxu0 }
 0x11c   : > { %v546_v21 = vpop.f32.mrb[15].mxu1  ;;  %v828_v22 = vpop.eup %827  ;;  %625 = vst.msk [vmem:[%s1101_s8 + $0x20] sm:$0xff] %vm620_vm1, %v826_v17 }
 0x11d   : > { %641 = vst.msk [vmem:[%s1101_s8 + $0xa0] sm:$0xff] %vm620_vm1, %v828_v22  ;;  %837 = vtanh.f32 %v465_v18 }
 0x11e   : > { %839 = vtanh.f32 %v545_v19  ;;  %v469_v23 = vpop.f32.mrb[16].mxu0  ;;  %v549_v24 = vpop.f32.mrb[16].mxu1 }
 0x11f   : > { %v830_v25 = vpop.eup %829  ;;  %v470_v26 = vadd.f32 %v1089_v28, %v469_v23  ;;  %v550_v27 = vadd.f32 %v1089_v28, %v549_v24  ;;  %v471_v29 = vpop.f32.mrb[17].mxu0 }
 0x120   : > { %v551_v30 = vpop.f32.mrb[17].mxu1  ;;  %v832_v31 = vpop.eup %831  ;;  %626 = vst.msk [vmem:[%s1101_s8 + $0x28] sm:$0xff] %vm620_vm1, %v830_v25 }
 0x121   : > { %642 = vst.msk [vmem:[%s1101_s8 + $0xa8] sm:$0xff] %vm620_vm1, %v832_v31  ;;  %841 = vtanh.f32 %v470_v26 }
 0x122   : > { %843 = vtanh.f32 %v550_v27  ;;  %v474_v32 = vpop.f32.mrb[18].mxu0  ;;  %v554_v33 = vpop.f32.mrb[18].mxu1 }
 0x123   : > { %v834_v34 = vpop.eup %833  ;;  %v475_v35 = vadd.f32 %v1089_v28, %v474_v32  ;;  %v555_v36 = vadd.f32 %v1089_v28, %v554_v33  ;;  %v476_v37 = vpop.f32.mrb[19].mxu0 }
 0x124   : > { %v556_v38 = vpop.f32.mrb[19].mxu1  ;;  %v836_v39 = vpop.eup %835  ;;  %627 = vst.msk [vmem:[%s1101_s8 + $0x30] sm:$0xff] %vm620_vm1, %v834_v34 }
 0x125   : > { %643 = vst.msk [vmem:[%s1101_s8 + $0xb0] sm:$0xff] %vm620_vm1, %v836_v39  ;;  %845 = vtanh.f32 %v475_v35 }
 0x126   : > { %847 = vtanh.f32 %v555_v36  ;;  %v479_v40 = vpop.f32.mrb[20].mxu0  ;;  %v559_v41 = vpop.f32.mrb[20].mxu1 }
 0x127   : > { %v838_v42 = vpop.eup %837  ;;  %v480_v43 = vadd.f32 %v1089_v28, %v479_v40  ;;  %v560_v44 = vadd.f32 %v1089_v28, %v559_v41  ;;  %v481_v45 = vpop.f32.mrb[21].mxu0 }
 0x128   : > { %v561_v46 = vpop.f32.mrb[21].mxu1  ;;  %v840_v47 = vpop.eup %839  ;;  %628 = vst.msk [vmem:[%s1101_s8 + $0x38] sm:$0xff] %vm620_vm1, %v838_v42 }
 0x129   : > { %644 = vst.msk [vmem:[%s1101_s8 + $0xb8] sm:$0xff] %vm620_vm1, %v840_v47  ;;  %849 = vtanh.f32 %v480_v43 }
 0x12a   : > { %851 = vtanh.f32 %v560_v44  ;;  %v484_v48 = vpop.f32.mrb[22].mxu0  ;;  %v564_v49 = vpop.f32.mrb[22].mxu1 }
 0x12b   : > { %v842_v50 = vpop.eup %841  ;;  %v485_v51 = vadd.f32 %v1089_v28, %v484_v48  ;;  %v565_v52 = vadd.f32 %v1089_v28, %v564_v49  ;;  %v486_v53 = vpop.f32.mrb[23].mxu0 }
 0x12c   : > { %v566_v54 = vpop.f32.mrb[23].mxu1  ;;  %v844_v55 = vpop.eup %843  ;;  %629 = vst.msk [vmem:[%s1101_s8 + $0x40] sm:$0xff] %vm620_vm1, %v842_v50 }
 0x12d   : > { %645 = vst.msk [vmem:[%s1101_s8 + $0xc0] sm:$0xff] %vm620_vm1, %v844_v55  ;;  %853 = vtanh.f32 %v485_v51 }
 0x12e   : > { %855 = vtanh.f32 %v565_v52  ;;  %v489_v56 = vpop.f32.mrb[24].mxu0  ;;  %v569_v57 = vpop.f32.mrb[24].mxu1 }
 0x12f   : > { %v846_v58 = vpop.eup %845  ;;  %v490_v59 = vadd.f32 %v1089_v28, %v489_v56  ;;  %v570_v60 = vadd.f32 %v1089_v28, %v569_v57  ;;  %v491_v61 = vpop.f32.mrb[25].mxu0 }
 0x130   : > { %v571_v62 = vpop.f32.mrb[25].mxu1  ;;  %v848_v63 = vpop.eup %847  ;;  %630 = vst.msk [vmem:[%s1101_s8 + $0x48] sm:$0xff] %vm620_vm1, %v846_v58 }
 0x131   : > { %646 = vst.msk [vmem:[%s1101_s8 + $0xc8] sm:$0xff] %vm620_vm1, %v848_v63  ;;  %857 = vtanh.f32 %v490_v59 }
 0x132   : > { %859 = vtanh.f32 %v570_v60  ;;  %v494_v0 = vpop.f32.mrb[26].mxu0  ;;  %v574_v1 = vpop.f32.mrb[26].mxu1 }
 0x133   : > { %v850_v2 = vpop.eup %849  ;;  %v495_v3 = vadd.f32 %v1089_v28, %v494_v0  ;;  %v575_v4 = vadd.f32 %v1089_v28, %v574_v1  ;;  %v496_v5 = vpop.f32.mrb[27].mxu0 }
 0x134   : > { %v576_v6 = vpop.f32.mrb[27].mxu1  ;;  %v852_v7 = vpop.eup %851  ;;  %631 = vst.msk [vmem:[%s1101_s8 + $0x50] sm:$0xff] %vm620_vm1, %v850_v2 }
 0x135   : > { %647 = vst.msk [vmem:[%s1101_s8 + $0xd0] sm:$0xff] %vm620_vm1, %v852_v7  ;;  %861 = vtanh.f32 %v495_v3 }
 0x136   : > { %863 = vtanh.f32 %v575_v4  ;;  %v499_v8 = vpop.f32.mrb[28].mxu0  ;;  %v579_v9 = vpop.f32.mrb[28].mxu1 }
 0x137   : > { %v854_v10 = vpop.eup %853  ;;  %v500_v11 = vadd.f32 %v1089_v28, %v499_v8  ;;  %v580_v12 = vadd.f32 %v1089_v28, %v579_v9  ;;  %v501_v13 = vpop.f32.mrb[29].mxu0 }
 0x138   : > { %v581_v14 = vpop.f32.mrb[29].mxu1  ;;  %v856_v15 = vpop.eup %855  ;;  %632 = vst.msk [vmem:[%s1101_s8 + $0x58] sm:$0xff] %vm620_vm1, %v854_v10 }
 0x139   : > { %648 = vst.msk [vmem:[%s1101_s8 + $0xd8] sm:$0xff] %vm620_vm1, %v856_v15  ;;  %865 = vtanh.f32 %v500_v11 }
 0x13a   : > { %867 = vtanh.f32 %v580_v12  ;;  %v504_v16 = vpop.f32.mrb[30].mxu0  ;;  %v584_v17 = vpop.f32.mrb[30].mxu1 }
 0x13b   : > { %v858_v18 = vpop.eup %857  ;;  %v505_v19 = vadd.f32 %v1089_v28, %v504_v16  ;;  %v585_v20 = vadd.f32 %v1089_v28, %v584_v17  ;;  %v506_v21 = vpop.f32.mrb[31].mxu0 }
 0x13c   : > { %v586_v22 = vpop.f32.mrb[31].mxu1  ;;  %v860_v23 = vpop.eup %859  ;;  %633 = vst.msk [vmem:[%s1101_s8 + $0x60] sm:$0xff] %vm620_vm1, %v858_v18 }
 0x13d   : > { %649 = vst.msk [vmem:[%s1101_s8 + $0xe0] sm:$0xff] %vm620_vm1, %v860_v23  ;;  %869 = vtanh.f32 %v505_v19 }
 0x13e   : > { %871 = vtanh.f32 %v585_v20 }
 0x13f   : > { %v862_v24 = vpop.eup %861 }
 0x140   : > { %v864_v25 = vpop.eup %863  ;;  %634 = vst.msk [vmem:[%s1101_s8 + $0x68] sm:$0xff] %vm620_vm1, %v862_v24 }
 0x141   : > { %650 = vst.msk [vmem:[%s1101_s8 + $0xe8] sm:$0xff] %vm620_vm1, %v864_v25 }
 0x143   : > { %v866_v26 = vpop.eup %865 }
 0x144   : > { %v868_v27 = vpop.eup %867  ;;  %635 = vst.msk [vmem:[%s1101_s8 + $0x70] sm:$0xff] %vm620_vm1, %v866_v26 }
 0x145   : > { %651 = vst.msk [vmem:[%s1101_s8 + $0xf0] sm:$0xff] %vm620_vm1, %v868_v27 }
 0x147   : > { %v870_v28 = vpop.eup %869 }
 0x148   : > { %v872_v29 = vpop.eup %871  ;;  %636 = vst.msk [vmem:[%s1101_s8 + $0x78] sm:$0xff] %vm620_vm1, %v870_v28 }
 0x149   : > { %652 = vst.msk [vmem:[%s1101_s8 + $0xf8] sm:$0xff] %vm620_vm1, %v872_v29 }
 0x14a PF: > { %s13_s12 = sadd.s32 1, %s879_s12  }
 0x14b   : > { %p10_p4 = scmp.ge.s32.totalorder %s13_s12, 4  }
 0x14d   :  { %12 = sbr.rel (!%p10_p4) target bundleno = 1 (0x1), region = 62 }

</bundles_post_ra>
